<compile_context>
chip_gen: v7x
topology: tpu7x:2x2x1
jax: 0.10.0
libtpu: 0.0.40
codegen_flags: <defaults>
</compile_context>

<pallas_src>
import functools
import math

import jax
import jax.numpy as jnp
from jax.experimental import pallas as pl
from jax.experimental.pallas import tpu as pltpu

_NEG_BIG = -1e30   # finite "-inf": no NaNs even for fully-masked query rows


def _mha_kernel(x_ref, bias_ref, wqkv_ref, bqkv_ref,
                gamma_ref, beta_ref, w1_ref, b1_ref, out_ref,
                *, heads, key_tile, approx_recip):
    """One grid step == `block_n` batch elements."""
    Nb, S, E = x_ref.shape
    H = heads
    Hd = E // H
    T = Nb * S
    B = Nb * H
    KT = key_tile
    mm_dtype = wqkv_ref.dtype            # bf16 in fast mode, f32 in precise mode

    x = x_ref[...].reshape(T, E)         # (Nb,S,E) -> (T,E): tile-aligned merge

    # Fused Q/K/V projection: one (T,E)x(E,3E) MXU pass, f32 accumulation.
    # (1/sqrt(E) is already folded into the Q columns by the wrapper.)
    qkv = jnp.dot(x, wqkv_ref[...],
                  preferred_element_type=jnp.float32) + bqkv_ref[0]   # (T,3E) f32

    def split_heads(col0):
        # (T, E) slab -> (Nb*H, S, Hd): heads folded into the leading batch dim
        # using only layout-friendly ops -- leading-dim reshapes, batched
        # minor-dim transposes, and a sublane split that keeps whole (8,128)
        # tiles intact (Hd % 8 == 0).  No per-head lane slicing.
        t = qkv[:, col0:col0 + E].reshape(Nb, S, E)
        t = jnp.swapaxes(t, 1, 2)         # (Nb, E, S)   batched minor transpose
        t = t.reshape(Nb, H, Hd, S)       # tile-aligned sublane split
        t = t.reshape(B, Hd, S)           # leading merge: b = n*H + h
        return jnp.swapaxes(t, 1, 2)      # (B, S, Hd)

    q = split_heads(0).astype(mm_dtype)   # pre-scaled by 1/sqrt(E)
    k = split_heads(E)                    # kept f32; tiles cast just-in-time
    v = split_heads(2 * E)

    bias = bias_ref[...]                  # (Nb, 1, S) additive key-padding bias

    # Online-softmax (flash) over key tiles: VMEM is O(S*KT), not O(S^2).
    # Static unroll; KT == S -> a single iteration (== plain softmax).
    # TODO(synk): for very long S, stage k/v in VMEM scratch and drive this with
    #             a fori_loop so live ranges stay bounded.
    m_i = jnp.full((B, S, 1), _NEG_BIG, jnp.float32)
    l_i = jnp.zeros((B, S, 1), jnp.float32)
    acc = jnp.zeros((B, S, Hd), jnp.float32)
    for t_idx in range(S // KT):
        ks = t_idx * KT
        k_t = k[:, ks:ks + KT, :].astype(mm_dtype)
        v_t = v[:, ks:ks + KT, :].astype(mm_dtype)
        s_t = jnp.einsum('bqd,bkd->bqk', q, k_t,
                         preferred_element_type=jnp.float32)          # (B,S,KT)
        # Additive key mask, pure broadcast over heads & queries (no jnp.tile).
        s_t = (s_t.reshape(Nb, H, S, KT)
               + bias[:, None, :, ks:ks + KT]).reshape(B, S, KT)
        m_new = jnp.maximum(m_i, jnp.max(s_t, axis=-1, keepdims=True))
        p_t = jnp.exp(s_t - m_new)
        corr = jnp.exp(m_i - m_new)
        l_i = corr * l_i + jnp.sum(p_t, axis=-1, keepdims=True)
        acc = corr * acc + jnp.einsum('bqk,bkd->bqd',
                                      p_t.astype(mm_dtype), v_t,
                                      preferred_element_type=jnp.float32)
        m_i = m_new

    ctx = acc * pl.reciprocal(l_i, approx=approx_recip)               # (B,S,Hd)

    # Heads back onto the embedding dim (inverse of split_heads).
    ctx = jnp.swapaxes(ctx, 1, 2)         # (B, Hd, S)
    ctx = ctx.reshape(Nb, H, Hd, S)       # leading split
    ctx = ctx.reshape(Nb, E, S)           # tile-aligned sublane merge
    ctx = jnp.swapaxes(ctx, 1, 2)         # (Nb, S, E)
    ctx = ctx.reshape(T, E)

    # LayerNorm over E in f32 (eps matches the nn.LayerNorm default).
    mu = jnp.mean(ctx, axis=-1, keepdims=True)
    var = jnp.mean((ctx - mu) ** 2, axis=-1, keepdims=True)
    ln = (ctx - mu) * jax.lax.rsqrt(var + 1e-5) * gamma_ref[0] + beta_ref[0]

    # Final linear projection.
    out = jnp.dot(ln.astype(mm_dtype), w1_ref[...],
                  preferred_element_type=jnp.float32) + b1_ref[0]
    out_ref[...] = out.reshape(Nb, S, E)


def _const_spec(shape):
    zeros = (0,) * len(shape)
    return pl.BlockSpec(shape, lambda n: zeros)   # weights: same block every step


def _vmem_capacity_bytes():
    try:
        return int(pltpu.get_tpu_info().vmem_capacity_bytes)
    except Exception:
        return 64 * 1024 * 1024                   # conservative (v7x per-core VMEM)


def _estimate_vmem_bytes(block_n, S, E, H, KT, x_itemsize):
    """Rough per-grid-step VMEM estimate (double-buffered I/O + intermediates)."""
    T, B, Hd = block_n * S, block_n * H, E // H
    io = T * E * (x_itemsize + 4) + block_n * S * 4            # x + out + bias blocks
    weights = 4 * E * E * x_itemsize + 8 * E * 4               # wqkv, w1, biases, LN
    interm = 4 * (T * 3 * E                                    # qkv
                  + 3 * T * E                                  # q, k, v
                  + 2 * B * S * KT                             # score + p tile
                  + B * S * (Hd + 2)                           # acc, m, l
                  + 2 * T * E)                                 # ctx, ln
    return 2 * io + 2 * weights + interm + (2 << 20)           # + compiler slack


def _auto_key_tile(S):
    if S <= 512:
        return S
    for kt in (512, 256, 128):
        if S % kt == 0:
            return kt
    return S


def _auto_block_n(N, S, E, H, KT, x_itemsize, vmem_budget):
    divisors = [d for d in range(1, N + 1) if N % d == 0]
    fits = [d for d in divisors
            if _estimate_vmem_bytes(d, S, E, H, KT, x_itemsize) <= vmem_budget]
    if not fits:
        return 1
    # Largest fitting block up to ~1024 tokens per step (keeps the MXU fed) ...
    capped = [d for d in fits if d * S <= max(1024, S)]
    bn = max(capped) if capped else min(fits)
    # ... but keep >= 8 grid steps for pipeline overlap / 2-TC sharding when the
    # per-step tile can stay >= 128 tokens.
    if N // bn < 8:
        alt = [d for d in fits if d * S >= 128 and N // d >= 8]
        if alt:
            bn = max(alt)
    return bn


def multihead_attention(x, pad_mask, params, heads, *,
                        block_n=None, key_tile=None, precise=False):
    """x: [N,S,E] f32; pad_mask: key-padding mask broadcastable to [N,1,1,S]."""
    N, S, E = x.shape
    H = heads
    assert E % H == 0
    Hd = E // H
    assert Hd % 8 == 0, "head_dim must be a multiple of 8 (f32 sublane tile)"
    assert S % 8 == 0, "pad the sequence length up to a multiple of 8"

    mm_dtype = jnp.float32 if precise else jnp.bfloat16
    x_itemsize = jnp.dtype(mm_dtype).itemsize

    if key_tile is None:
        key_tile = _auto_key_tile(S)
    assert S % key_tile == 0

    vmem_cap = _vmem_capacity_bytes()
    vmem_limit = min(int(vmem_cap * 0.75), 112 * 1024 * 1024)
    if block_n is None:
        block_n = _auto_block_n(N, S, E, H, key_tile, x_itemsize, vmem_limit)
    assert N % block_n == 0

    inv_sqrt_e = 1.0 / math.sqrt(E)
    # Fused Q/K/V into one [E, 3E] weight / [1, 3E] bias; fold the 1/sqrt(E)
    # attention scale into the Q projection (zero in-kernel cost).
    wqkv = jnp.concatenate(
        [params["wq"] * inv_sqrt_e, params["wk"], params["wv"]], axis=1
    ).astype(mm_dtype)
    bqkv = jnp.concatenate(
        [params["bq"] * inv_sqrt_e, params["bk"], params["bv"]], axis=1
    ).astype(jnp.float32)
    w1 = params["w1"].astype(mm_dtype)

    # Thin key mask -> additive bias [N, 1, S]; broadcast in-register in-kernel
    # (no [N, H, S, S] mask materialization / DMA).
    # TODO(synk): general per-query masks (e.g. causal [N,H,S,S]) need a full-score mask path.
    key_mask = jnp.broadcast_to(pad_mask, (N, 1, 1, S)).reshape(N, 1, S)
    bias = jnp.where(key_mask == 0, _NEG_BIG, 0.0).astype(jnp.float32)

    kernel = functools.partial(_mha_kernel, heads=H, key_tile=key_tile,
                               approx_recip=not precise)

    # TODO(synk): single-buffer the constant weight blocks (pipeline_mode=
    #             pl.Buffered(1)); with constant index maps they are DMA'd only
    #             once but still reserve a second buffer today.
    out = pl.pallas_call(
        kernel,
        out_shape=jax.ShapeDtypeStruct((N, S, E), jnp.float32),
        grid=(N // block_n,),
        in_specs=[
            pl.BlockSpec((block_n, S, E), lambda n: (n, 0, 0)),   # tokens
            pl.BlockSpec((block_n, 1, S), lambda n: (n, 0, 0)),   # key-mask bias
            _const_spec((E, 3 * E)), _const_spec((1, 3 * E)),     # fused QKV w/b
            _const_spec((1, E)), _const_spec((1, E)),             # LN gamma/beta
            _const_spec((E, E)), _const_spec((1, E)),             # linear1 w/b
        ],
        out_specs=pl.BlockSpec((block_n, S, E), lambda n: (n, 0, 0)),
        compiler_params=pltpu.CompilerParams(
            dimension_semantics=("parallel",),
            vmem_limit_bytes=vmem_limit),
    )(x.astype(mm_dtype), bias, wqkv, bqkv,
      params["gamma"], params["beta"], w1, params["b1"])
    return out


def reference(x, pad_mask, p, heads):
    """Pure-JAX reference mirroring the PyTorch forward."""
    N, S, E = x.shape
    Hd = E // heads
    q = (x @ p["wq"] + p["bq"][0]).reshape(N, S, heads, Hd)
    k = (x @ p["wk"] + p["bk"][0]).reshape(N, S, heads, Hd)
    v = (x @ p["wv"] + p["bv"][0]).reshape(N, S, heads, Hd)
    score = jnp.einsum("nqhd,nkhd->nhqk", q, k)
    score = jnp.where(jnp.broadcast_to(pad_mask, score.shape) == 0,
                      -jnp.inf, score)
    att = jax.nn.softmax(score / math.sqrt(E), axis=-1)
    ctx = jnp.einsum("nhqk,nkhd->nqhd", att, v).reshape(N, S, E)
    mu = ctx.mean(-1, keepdims=True)
    var = ((ctx - mu) ** 2).mean(-1, keepdims=True)
    ln = (ctx - mu) / jnp.sqrt(var + 1e-5) * p["gamma"][0] + p["beta"][0]
    return ln @ p["w1"] + p["b1"][0]


def init_params(key, embedding_dim):
    E = embedding_dim
    keys = jax.random.split(key, 8)
    scale = 1.0 / math.sqrt(E)
    return {
        "wq": jax.random.uniform(keys[0], (E, E), jnp.float32, -scale, scale),
        "bq": jax.random.uniform(keys[1], (1, E), jnp.float32, -scale, scale),
        "wk": jax.random.uniform(keys[2], (E, E), jnp.float32, -scale, scale),
        "bk": jax.random.uniform(keys[3], (1, E), jnp.float32, -scale, scale),
        "wv": jax.random.uniform(keys[4], (E, E), jnp.float32, -scale, scale),
        "bv": jax.random.uniform(keys[5], (1, E), jnp.float32, -scale, scale),
        "gamma": jnp.ones((1, E), jnp.float32),   # nn.LayerNorm default weight
        "beta": jnp.zeros((1, E), jnp.float32),   # nn.LayerNorm default bias
        "w1": jax.random.uniform(keys[6], (E, E), jnp.float32, -scale, scale),
        "b1": jax.random.uniform(keys[7], (1, E), jnp.float32, -scale, scale),
    }


if __name__ == "__main__":
    N, S, E, H = 4, 16, 32, 4   # batch, seq-len, embedding_dim, heads

    root = jax.random.PRNGKey(0)
    k_x, k_p = jax.random.split(root)
    x = jax.random.normal(k_x, (N, S, E), jnp.float32)

    # Padding mask: per-batch number of valid key tokens (no fully-masked rows).
    lengths = jnp.array([16, 11, 7, 3], jnp.int32)
    key_valid = (jnp.arange(S)[None, :] < lengths[:, None]).astype(jnp.float32)
    pad_mask = key_valid.reshape(N, 1, 1, S)       # broadcast over heads/queries

    params = init_params(k_p, E)
    ref = reference(x, pad_mask, params, H)

    # 1) Precise path (f32 MXU); key_tile=8 exercises the 2-tile online softmax,
    #    block_n=2 exercises a multi-step grid with Nb > 1.
    out_f32 = multihead_attention(x, pad_mask, params, H,
                                  precise=True, key_tile=8, block_n=2)
    out_f32 = jax.block_until_ready(out_f32)
    assert out_f32.shape == (N, S, E)
    assert jnp.allclose(out_f32, ref, atol=1e-4, rtol=1e-4), "f32 mismatch vs reference"

    # 2) Fast path (bf16 MXU operands, f32 accumulation, approx reciprocal),
    #    auto block / key tiling.  Looser tolerance for bf16 matmuls.
    out_fast = multihead_attention(x, pad_mask, params, H)
    out_fast = jax.block_until_ready(out_fast)
    assert out_fast.shape == (N, S, E)
    assert jnp.allclose(out_fast, ref, atol=8e-2, rtol=8e-2), "bf16 mismatch vs reference"

    print("KERNEL_OK")
</pallas_src>

<mosaic_0001>
module attributes {stable_mosaic.version = 11 : i64} {
  func.func @_mha_kernel(%arg0: i32, %arg1: memref<2x16x32xf32, #tpu.memory_space<vmem>>, %arg2: memref<2x1x16xf32, #tpu.memory_space<vmem>>, %arg3: memref<32x96xf32, #tpu.memory_space<vmem>>, %arg4: memref<1x96xf32, #tpu.memory_space<vmem>>, %arg5: memref<1x32xf32, #tpu.memory_space<vmem>>, %arg6: memref<1x32xf32, #tpu.memory_space<vmem>>, %arg7: memref<32x32xf32, #tpu.memory_space<vmem>>, %arg8: memref<1x32xf32, #tpu.memory_space<vmem>>, %arg9: memref<2x16x32xf32, #tpu.memory_space<vmem>>) attributes {dimension_semantics = [#tpu.dimension_semantics<parallel>], iteration_bounds = array<i64: 2>, scalar_prefetch = 0 : i64, scratch_operands = 0 : i64, tpu.core_type = #tpu.core_type<tc>, window_params = [{transform_indices = @transform_0, window_bounds = array<i64: 2, 16, 32>}, {transform_indices = @transform_1, window_bounds = array<i64: 2, 1, 16>}, {pipeline_mode = #tpu.pipeline_mode<synchronous>, transform_indices = @transform_2, window_bounds = array<i64: 32, 96>}, {pipeline_mode = #tpu.pipeline_mode<synchronous>, transform_indices = @transform_3, window_bounds = array<i64: 1, 96>}, {pipeline_mode = #tpu.pipeline_mode<synchronous>, transform_indices = @transform_4, window_bounds = array<i64: 1, 32>}, {pipeline_mode = #tpu.pipeline_mode<synchronous>, transform_indices = @transform_5, window_bounds = array<i64: 1, 32>}, {pipeline_mode = #tpu.pipeline_mode<synchronous>, transform_indices = @transform_6, window_bounds = array<i64: 32, 32>}, {pipeline_mode = #tpu.pipeline_mode<synchronous>, transform_indices = @transform_7, window_bounds = array<i64: 1, 32>}, {transform_indices = @transform_8, window_bounds = array<i64: 2, 16, 32>}]} {
    %c0 = arith.constant 0 : index
    %c0_0 = arith.constant 0 : index
    %c0_1 = arith.constant 0 : index
    %0 = vector.load %arg1[%c0, %c0_0, %c0_1] : memref<2x16x32xf32, #tpu.memory_space<vmem>>, vector<2x16x32xf32>
    %1 = vector.shape_cast %0 : vector<2x16x32xf32> to vector<32x32xf32>
    %c0_2 = arith.constant 0 : index
    %c0_3 = arith.constant 0 : index
    %2 = vector.load %arg3[%c0_2, %c0_3] : memref<32x96xf32, #tpu.memory_space<vmem>>, vector<32x96xf32>
    %cst = arith.constant dense<0.000000e+00> : vector<32x96xf32>
    %3 = tpu.matmul %1, %2, %cst {dimension_numbers = #tpu.dot_dimension_numbers<[1], [0], [0], [1], [0, 0, 1, 1], [], []>} : vector<32x32xf32>, vector<32x96xf32>, vector<32x96xf32> -> vector<32x96xf32>
    %c0_4 = arith.constant 0 : index
    %c0_5 = arith.constant 0 : index
    %4 = vector.load %arg4[%c0_4, %c0_5] : memref<1x96xf32, #tpu.memory_space<vmem>>, vector<1x96xf32>
    %5 = vector.shape_cast %4 : vector<1x96xf32> to vector<96xf32>
    %6 = vector.shape_cast %5 : vector<96xf32> to vector<1x96xf32>
    %7 = vector.broadcast %6 : vector<1x96xf32> to vector<32x96xf32>
    %8 = arith.addf %3, %7 : vector<32x96xf32>
    %9 = vector.extract_strided_slice %8 {offsets = [0, 0], sizes = [32, 32], strides = [1, 1]} : vector<32x96xf32> to vector<32x32xf32>
    %10 = vector.shape_cast %9 : vector<32x32xf32> to vector<2x16x32xf32>
    %11 = tpu.transpose %10, [0, 2, 1] : vector<2x16x32xf32> -> vector<2x32x16xf32>
    %12 = vector.shape_cast %11 : vector<2x32x16xf32> to vector<2x4x8x16xf32>
    %13 = vector.shape_cast %12 : vector<2x4x8x16xf32> to vector<8x8x16xf32>
    %14 = tpu.transpose %13, [0, 2, 1] : vector<8x8x16xf32> -> vector<8x16x8xf32>
    %15 = vector.extract_strided_slice %8 {offsets = [0, 32], sizes = [32, 32], strides = [1, 1]} : vector<32x96xf32> to vector<32x32xf32>
    %16 = vector.shape_cast %15 : vector<32x32xf32> to vector<2x16x32xf32>
    %17 = tpu.transpose %16, [0, 2, 1] : vector<2x16x32xf32> -> vector<2x32x16xf32>
    %18 = vector.shape_cast %17 : vector<2x32x16xf32> to vector<2x4x8x16xf32>
    %19 = vector.shape_cast %18 : vector<2x4x8x16xf32> to vector<8x8x16xf32>
    %20 = tpu.transpose %19, [0, 2, 1] : vector<8x8x16xf32> -> vector<8x16x8xf32>
    %21 = vector.extract_strided_slice %8 {offsets = [0, 64], sizes = [32, 32], strides = [1, 1]} : vector<32x96xf32> to vector<32x32xf32>
    %22 = vector.shape_cast %21 : vector<32x32xf32> to vector<2x16x32xf32>
    %23 = tpu.transpose %22, [0, 2, 1] : vector<2x16x32xf32> -> vector<2x32x16xf32>
    %24 = vector.shape_cast %23 : vector<2x32x16xf32> to vector<2x4x8x16xf32>
    %25 = vector.shape_cast %24 : vector<2x4x8x16xf32> to vector<8x8x16xf32>
    %26 = tpu.transpose %25, [0, 2, 1] : vector<8x8x16xf32> -> vector<8x16x8xf32>
    %c0_6 = arith.constant 0 : index
    %c0_7 = arith.constant 0 : index
    %c0_8 = arith.constant 0 : index
    %27 = vector.load %arg2[%c0_6, %c0_7, %c0_8] : memref<2x1x16xf32, #tpu.memory_space<vmem>>, vector<2x1x16xf32>
    %cst_9 = arith.constant -1.000000e+30 : f32
    %28 = vector.broadcast %cst_9 : f32 to vector<8x16x1xf32>
    %cst_10 = arith.constant 0.000000e+00 : f32
    %29 = vector.broadcast %cst_10 : f32 to vector<8x16x1xf32>
    %cst_11 = arith.constant 0.000000e+00 : f32
    %30 = vector.broadcast %cst_11 : f32 to vector<8x16x8xf32>
    %31 = vector.extract_strided_slice %20 {offsets = [0, 0, 0], sizes = [8, 8, 8], strides = [1, 1, 1]} : vector<8x16x8xf32> to vector<8x8x8xf32>
    %32 = vector.extract_strided_slice %26 {offsets = [0, 0, 0], sizes = [8, 8, 8], strides = [1, 1, 1]} : vector<8x16x8xf32> to vector<8x8x8xf32>
    "tpu.trace_start"() <{level = 10 : i32, message = "bqd,bkd->bqk"}> : () -> ()
    %cst_12 = arith.constant dense<0.000000e+00> : vector<8x16x8xf32>
    %33 = tpu.matmul %14, %31, %cst_12 {dimension_numbers = #tpu.dot_dimension_numbers<[2], [2], [1], [1], [0, 0, 0, 1, 1, 1], [0], [0]>} : vector<8x16x8xf32>, vector<8x8x8xf32>, vector<8x16x8xf32> -> vector<8x16x8xf32>
    "tpu.trace_stop"() : () -> ()
    %34 = vector.shape_cast %33 : vector<8x16x8xf32> to vector<2x4x16x8xf32>
    %35 = vector.extract_strided_slice %27 {offsets = [0, 0, 0], sizes = [2, 1, 8], strides = [1, 1, 1]} : vector<2x1x16xf32> to vector<2x1x8xf32>
    %36 = vector.shape_cast %35 : vector<2x1x8xf32> to vector<2x1x1x8xf32>
    %37 = vector.broadcast %36 : vector<2x1x1x8xf32> to vector<2x4x16x8xf32>
    %38 = arith.addf %34, %37 : vector<2x4x16x8xf32>
    %39 = vector.shape_cast %38 : vector<2x4x16x8xf32> to vector<8x16x8xf32>
    %cst_13 = arith.constant dense<0xFF800000> : vector<8x16xf32>
    %40 = vector.multi_reduction <maximumf>, %39, %cst_13 [2] : vector<8x16x8xf32> to vector<8x16xf32>
    %41 = vector.shape_cast %40 : vector<8x16xf32> to vector<8x16x1xf32>
    %42 = arith.maximumf %28, %41 : vector<8x16x1xf32>
    %43 = vector.broadcast %42 : vector<8x16x1xf32> to vector<8x16x8xf32>
    %44 = arith.subf %39, %43 : vector<8x16x8xf32>
    %45 = math.exp %44 : vector<8x16x8xf32>
    %46 = arith.subf %28, %42 : vector<8x16x1xf32>
    %47 = math.exp %46 : vector<8x16x1xf32>
    %48 = arith.mulf %47, %29 : vector<8x16x1xf32>
    %cst_14 = arith.constant dense<0.000000e+00> : vector<8x16xf32>
    %49 = vector.multi_reduction <add>, %45, %cst_14 [2] : vector<8x16x8xf32> to vector<8x16xf32>
    %50 = vector.shape_cast %49 : vector<8x16xf32> to vector<8x16x1xf32>
    %51 = arith.addf %48, %50 : vector<8x16x1xf32>
    %52 = vector.broadcast %47 : vector<8x16x1xf32> to vector<8x16x8xf32>
    %53 = arith.mulf %52, %30 : vector<8x16x8xf32>
    "tpu.trace_start"() <{level = 10 : i32, message = "bqk,bkd->bqd"}> : () -> ()
    %cst_15 = arith.constant dense<0.000000e+00> : vector<8x16x8xf32>
    %54 = tpu.matmul %45, %32, %cst_15 {dimension_numbers = #tpu.dot_dimension_numbers<[2], [1], [1], [2], [0, 0, 0, 1, 1, 2], [0], [0]>} : vector<8x16x8xf32>, vector<8x8x8xf32>, vector<8x16x8xf32> -> vector<8x16x8xf32>
    "tpu.trace_stop"() : () -> ()
    %55 = arith.addf %53, %54 : vector<8x16x8xf32>
    %56 = vector.extract_strided_slice %20 {offsets = [0, 8, 0], sizes = [8, 8, 8], strides = [1, 1, 1]} : vector<8x16x8xf32> to vector<8x8x8xf32>
    %57 = vector.extract_strided_slice %26 {offsets = [0, 8, 0], sizes = [8, 8, 8], strides = [1, 1, 1]} : vector<8x16x8xf32> to vector<8x8x8xf32>
    "tpu.trace_start"() <{level = 10 : i32, message = "bqd,bkd->bqk"}> : () -> ()
    %cst_16 = arith.constant dense<0.000000e+00> : vector<8x16x8xf32>
    %58 = tpu.matmul %14, %56, %cst_16 {dimension_numbers = #tpu.dot_dimension_numbers<[2], [2], [1], [1], [0, 0, 0, 1, 1, 1], [0], [0]>} : vector<8x16x8xf32>, vector<8x8x8xf32>, vector<8x16x8xf32> -> vector<8x16x8xf32>
    "tpu.trace_stop"() : () -> ()
    %59 = vector.shape_cast %58 : vector<8x16x8xf32> to vector<2x4x16x8xf32>
    %60 = vector.extract_strided_slice %27 {offsets = [0, 0, 8], sizes = [2, 1, 8], strides = [1, 1, 1]} : vector<2x1x16xf32> to vector<2x1x8xf32>
    %61 = vector.shape_cast %60 : vector<2x1x8xf32> to vector<2x1x1x8xf32>
    %62 = vector.broadcast %61 : vector<2x1x1x8xf32> to vector<2x4x16x8xf32>
    %63 = arith.addf %59, %62 : vector<2x4x16x8xf32>
    %64 = vector.shape_cast %63 : vector<2x4x16x8xf32> to vector<8x16x8xf32>
    %cst_17 = arith.constant dense<0xFF800000> : vector<8x16xf32>
    %65 = vector.multi_reduction <maximumf>, %64, %cst_17 [2] : vector<8x16x8xf32> to vector<8x16xf32>
    %66 = vector.shape_cast %65 : vector<8x16xf32> to vector<8x16x1xf32>
    %67 = arith.maximumf %42, %66 : vector<8x16x1xf32>
    %68 = vector.broadcast %67 : vector<8x16x1xf32> to vector<8x16x8xf32>
    %69 = arith.subf %64, %68 : vector<8x16x8xf32>
    %70 = math.exp %69 : vector<8x16x8xf32>
    %71 = arith.subf %42, %67 : vector<8x16x1xf32>
    %72 = math.exp %71 : vector<8x16x1xf32>
    %73 = arith.mulf %72, %51 : vector<8x16x1xf32>
    %cst_18 = arith.constant dense<0.000000e+00> : vector<8x16xf32>
    %74 = vector.multi_reduction <add>, %70, %cst_18 [2] : vector<8x16x8xf32> to vector<8x16xf32>
    %75 = vector.shape_cast %74 : vector<8x16xf32> to vector<8x16x1xf32>
    %76 = arith.addf %73, %75 : vector<8x16x1xf32>
    %77 = vector.broadcast %72 : vector<8x16x1xf32> to vector<8x16x8xf32>
    %78 = arith.mulf %77, %55 : vector<8x16x8xf32>
    "tpu.trace_start"() <{level = 10 : i32, message = "bqk,bkd->bqd"}> : () -> ()
    %cst_19 = arith.constant dense<0.000000e+00> : vector<8x16x8xf32>
    %79 = tpu.matmul %70, %57, %cst_19 {dimension_numbers = #tpu.dot_dimension_numbers<[2], [1], [1], [2], [0, 0, 0, 1, 1, 2], [0], [0]>} : vector<8x16x8xf32>, vector<8x8x8xf32>, vector<8x16x8xf32> -> vector<8x16x8xf32>
    "tpu.trace_stop"() : () -> ()
    %80 = arith.addf %78, %79 : vector<8x16x8xf32>
    %81 = tpu.reciprocal %76 : vector<8x16x1xf32> -> vector<8x16x1xf32>
    %82 = vector.broadcast %81 : vector<8x16x1xf32> to vector<8x16x8xf32>
    %83 = arith.mulf %80, %82 : vector<8x16x8xf32>
    %84 = tpu.transpose %83, [0, 2, 1] : vector<8x16x8xf32> -> vector<8x8x16xf32>
    %85 = vector.shape_cast %84 : vector<8x8x16xf32> to vector<2x4x8x16xf32>
    %86 = vector.shape_cast %85 : vector<2x4x8x16xf32> to vector<2x32x16xf32>
    %87 = tpu.transpose %86, [0, 2, 1] : vector<2x32x16xf32> -> vector<2x16x32xf32>
    %88 = vector.shape_cast %87 : vector<2x16x32xf32> to vector<32x32xf32>
    %cst_20 = arith.constant dense<0.000000e+00> : vector<32xf32>
    %89 = vector.multi_reduction <add>, %88, %cst_20 [1] : vector<32x32xf32> to vector<32xf32>
    %90 = vector.shape_cast %89 : vector<32xf32> to vector<32x1xf32>
    %cst_21 = arith.constant 3.200000e+01 : f32
    %91 = vector.broadcast %cst_21 : f32 to vector<32x1xf32>
    %92 = arith.divf %90, %91 : vector<32x1xf32>
    %93 = vector.broadcast %92 : vector<32x1xf32> to vector<32x32xf32>
    %94 = arith.subf %88, %93 : vector<32x32xf32>
    %95 = arith.mulf %94, %94 : vector<32x32xf32>
    %cst_22 = arith.constant dense<0.000000e+00> : vector<32xf32>
    %96 = vector.multi_reduction <add>, %95, %cst_22 [1] : vector<32x32xf32> to vector<32xf32>
    %97 = vector.shape_cast %96 : vector<32xf32> to vector<32x1xf32>
    %cst_23 = arith.constant 3.200000e+01 : f32
    %98 = vector.broadcast %cst_23 : f32 to vector<32x1xf32>
    %99 = arith.divf %97, %98 : vector<32x1xf32>
    %100 = vector.broadcast %92 : vector<32x1xf32> to vector<32x32xf32>
    %101 = arith.subf %88, %100 : vector<32x32xf32>
    %cst_24 = arith.constant 9.99999974E-6 : f32
    %102 = vector.broadcast %cst_24 : f32 to vector<32x1xf32>
    %103 = arith.addf %99, %102 : vector<32x1xf32>
    %104 = math.rsqrt %103 : vector<32x1xf32>
    %105 = vector.broadcast %104 : vector<32x1xf32> to vector<32x32xf32>
    %106 = arith.mulf %101, %105 : vector<32x32xf32>
    %c0_25 = arith.constant 0 : index
    %c0_26 = arith.constant 0 : index
    %107 = vector.load %arg5[%c0_25, %c0_26] : memref<1x32xf32, #tpu.memory_space<vmem>>, vector<1x32xf32>
    %108 = vector.shape_cast %107 : vector<1x32xf32> to vector<32xf32>
    %109 = vector.shape_cast %108 : vector<32xf32> to vector<1x32xf32>
    %110 = vector.broadcast %109 : vector<1x32xf32> to vector<32x32xf32>
    %111 = arith.mulf %106, %110 : vector<32x32xf32>
    %c0_27 = arith.constant 0 : index
    %c0_28 = arith.constant 0 : index
    %112 = vector.load %arg6[%c0_27, %c0_28] : memref<1x32xf32, #tpu.memory_space<vmem>>, vector<1x32xf32>
    %113 = vector.shape_cast %112 : vector<1x32xf32> to vector<32xf32>
    %114 = vector.shape_cast %113 : vector<32xf32> to vector<1x32xf32>
    %115 = vector.broadcast %114 : vector<1x32xf32> to vector<32x32xf32>
    %116 = arith.addf %111, %115 : vector<32x32xf32>
    %c0_29 = arith.constant 0 : index
    %c0_30 = arith.constant 0 : index
    %117 = vector.load %arg7[%c0_29, %c0_30] : memref<32x32xf32, #tpu.memory_space<vmem>>, vector<32x32xf32>
    %cst_31 = arith.constant dense<0.000000e+00> : vector<32x32xf32>
    %118 = tpu.matmul %116, %117, %cst_31 {dimension_numbers = #tpu.dot_dimension_numbers<[1], [0], [0], [1], [0, 0, 1, 1], [], []>} : vector<32x32xf32>, vector<32x32xf32>, vector<32x32xf32> -> vector<32x32xf32>
    %c0_32 = arith.constant 0 : index
    %c0_33 = arith.constant 0 : index
    %119 = vector.load %arg8[%c0_32, %c0_33] : memref<1x32xf32, #tpu.memory_space<vmem>>, vector<1x32xf32>
    %120 = vector.shape_cast %119 : vector<1x32xf32> to vector<32xf32>
    %121 = vector.shape_cast %120 : vector<32xf32> to vector<1x32xf32>
    %122 = vector.broadcast %121 : vector<1x32xf32> to vector<32x32xf32>
    %123 = arith.addf %118, %122 : vector<32x32xf32>
    %124 = vector.shape_cast %123 : vector<32x32xf32> to vector<2x16x32xf32>
    %c0_34 = arith.constant 0 : index
    %c0_35 = arith.constant 0 : index
    %c0_36 = arith.constant 0 : index
    %125 = vector.load %arg9[%c0_34, %c0_35, %c0_36] : memref<2x16x32xf32, #tpu.memory_space<vmem>>, vector<2x16x32xf32>
    tpu.vector_store %arg9[%c0_34, %c0_35, %c0_36], %124 {strides = array<i32>} : memref<2x16x32xf32, #tpu.memory_space<vmem>>, vector<2x16x32xf32>,
    return
  }
  func.func @transform_0(%arg0: i32) -> (i32, i32, i32) {
    %c0_i32 = arith.constant 0 : i32
    %c0_i32_0 = arith.constant 0 : i32
    %c0_i32_1 = arith.constant 0 : i32
    return %arg0, %c0_i32, %c0_i32_0 : i32, i32, i32
  }
  func.func @transform_1(%arg0: i32) -> (i32, i32, i32) {
    %c0_i32 = arith.constant 0 : i32
    %c0_i32_0 = arith.constant 0 : i32
    %c0_i32_1 = arith.constant 0 : i32
    return %arg0, %c0_i32, %c0_i32_0 : i32, i32, i32
  }
  func.func @transform_2(%arg0: i32) -> (i32, i32) {
    %c0_i32 = arith.constant 0 : i32
    %c0_i32_0 = arith.constant 0 : i32
    %c0_i32_1 = arith.constant 0 : i32
    return %c0_i32, %c0_i32_0 : i32, i32
  }
  func.func @transform_3(%arg0: i32) -> (i32, i32) {
    %c0_i32 = arith.constant 0 : i32
    %c0_i32_0 = arith.constant 0 : i32
    %c0_i32_1 = arith.constant 0 : i32
    return %c0_i32, %c0_i32_0 : i32, i32
  }
  func.func @transform_4(%arg0: i32) -> (i32, i32) {
    %c0_i32 = arith.constant 0 : i32
    %c0_i32_0 = arith.constant 0 : i32
    %c0_i32_1 = arith.constant 0 : i32
    return %c0_i32, %c0_i32_0 : i32, i32
  }
  func.func @transform_5(%arg0: i32) -> (i32, i32) {
    %c0_i32 = arith.constant 0 : i32
    %c0_i32_0 = arith.constant 0 : i32
    %c0_i32_1 = arith.constant 0 : i32
    return %c0_i32, %c0_i32_0 : i32, i32
  }
  func.func @transform_6(%arg0: i32) -> (i32, i32) {
    %c0_i32 = arith.constant 0 : i32
    %c0_i32_0 = arith.constant 0 : i32
    %c0_i32_1 = arith.constant 0 : i32
    return %c0_i32, %c0_i32_0 : i32, i32
  }
  func.func @transform_7(%arg0: i32) -> (i32, i32) {
    %c0_i32 = arith.constant 0 : i32
    %c0_i32_0 = arith.constant 0 : i32
    %c0_i32_1 = arith.constant 0 : i32
    return %c0_i32, %c0_i32_0 : i32, i32
  }
  func.func @transform_8(%arg0: i32) -> (i32, i32, i32) {
    %c0_i32 = arith.constant 0 : i32
    %c0_i32_0 = arith.constant 0 : i32
    %c0_i32_1 = arith.constant 0 : i32
    return %arg0, %c0_i32, %c0_i32_0 : i32, i32, i32
  }
}

</mosaic_0001>

<bundles_post_ra>
// kernel: tpu_custom_call.1
= control target key start
LH: loop header
LB: loop body
LE: loop exit
PB: predicated region body
PF: predicated region fallthrough
CT: control target
= control target key end

     0   :  { %s7069_s0 = inlined_call_operand.hbm [shape: f32[4,16,32], index: 0, kind: input, shape index: {}]   ;;  %s7070_s1 = inlined_call_operand.hbm [shape: f32[4,1,16], index: 1, kind: input, shape index: {}]   ;;  %s7071_s2 = inlined_call_operand.hbm [shape: f32[32,96], index: 2, kind: input, shape index: {}]   ;;  %s7072_s3 = inlined_call_operand.vmem [shape: f32[1,96], index: 3, kind: input, shape index: {}]   ;;  %s7073_s4 = inlined_call_operand.vmem [shape: f32[1,32], index: 4, kind: input, shape index: {}]   ;;  %s7074_s5 = inlined_call_operand.vmem [shape: f32[1,32], index: 5, kind: input, shape index: {}]   ;;  %s7075_s6 = inlined_call_operand.hbm [shape: f32[32,32], index: 6, kind: input, shape index: {}]   ;;  %s7076_s7 = inlined_call_operand.vmem [shape: f32[1,32], index: 7, kind: input, shape index: {}]   ;;  %s7077_s8 = inlined_call_operand.hbm [shape: f32[4,16,32], index: 8, kind: output, shape index: {}]  }
   0x1   :  { %7092 = sst [smem:[#allocation34_spill]] %s7069_s0 }
   0x2   :  { %7093 = sst [smem:[#allocation35_spill]] %s7071_s2 }
   0x3   :  { %7094 = sst [smem:[#allocation36_spill]] %s7075_s6 }
   0x4   :  { %13 = vsyncpa [#allocation3], 0 }
   0x5   :  { %15 = vsyncpa [#allocation3 + $0x1], 0 }
   0x6   :  { %16 = vsyncpa [#allocation6], 0 }
   0x7   :  { %18 = vsyncpa [#allocation6 + $0x1], 0 }
   0x8   :  { %19 = vsyncpa [#allocation9], 0 }
   0x9   :  { %20 = vsyncpa [#allocation4], 0 }
   0xa   :  { %22 = vsyncpa [#allocation4 + $0x1], 0  ;;  %s5812_s27 = smov 0   ;;  %s5814_s28 = smov 0  }
   0xb   :  { %s5816_s29 = smov 0   ;;  %s5818_s30 = smov 0  }
   0xc LB: > { %7095 = sst [smem:[#allocation16_spill]] %s5747_s29  ;;  %s5833_s9 = sadd.s32 4294967295, %s5751_s30   ;;  %s5751_s30 = sphi %s5818_s30, %s7175_s30   ;;  %s5747_s29 = sphi %s5816_s29, %s7180_s29   ;;  %s5743_s28 = sphi %s5814_s28, %s7179_s28   ;;  %s5739_s27 = sphi %s5812_s27, %s7178_s27  }
   0xd   : > { %s4868_s10 = sadd.s32 4294967294, %s5751_s30   ;;  %p48_p0 = scmp.ne.s32.totalorder %s5743_s28, %s5739_s27 }
   0xe   : > { %p7078_p1 = scmp.eq.s32.totalorder %s5833_s9, 0  ;;  %p230_p3 = scmp.eq.s32.totalorder %s4868_s10, 1 }
   0xf   : > { %p4869_p5 = scmp.ge.s32.totalorder %s5751_s30, 1  ;;  %p237_p7 = scmp.lt.s32.totalorder %s5751_s30, 3 }
  0x10   : > { %p5842_p4 = por %p7078_p1, %p48_p0  ;;  %p5847_p6 = por %p230_p3, %p48_p0 }
  0x11   : > { %p5852_p8 = pnand %p4869_p5, %p237_p7  ;;  %s5753_s14 = smov [#allocation7]  }
  0x12   : > { %s7096_s11 = scalar_select %p5842_p4, 1, 0 }
  0x13   : > { %s7097_s12 = scalar_select %p5847_p6, 1, 0 }
  0x14   : > { %s249_s15 = sshll.u32 %s5753_s14, 4  ;;  %p5321_p9 = pneg %p5852_p8  ;;  %s5856_s15 = int_to_ptr.vmem [resolvable:$true] %s249_s15 }
  0x15   : > { %s5754_s17 = smov [#allocation8]   ;;  %s7100_s2 = sld [smem:[#allocation35_spill]] }
  0x16   : > { %p5863_p11 = pnand %p5321_p9, %p7078_p1  ;;  %s271_s18 = sshll.u32 %s5754_s17, 4  ;;  %s5867_s18 = int_to_ptr.vmem [resolvable:$true] %s271_s18 }
  0x18   : > { %p5559_p13 = pneg %p5863_p11 }
  0x1b   : > { %s5557_s21 = scalar_lea.hbm %s7100_s2, 512 }
  0x1c   : > { %p5558_p12 = scmp.ne.s32.totalorder %s7100_s2, %s5557_s21  ;;  %p5564_p5 = scmp.lt.u32.totalorder %s5557_s21, %s7100_s2 }
  0x1e   : > { %p5560_p0 = pnand %p5559_p13, %p5558_p12 }
  0x20   : > { %p5561_p3 = pneg %p5560_p0 }
  0x22   : > { %p5566_p7 = pnand %p5564_p5, %p5561_p3 }
  0x24   : > { %5569 = shalt.err (!%p5566_p7)
}
  0x25   : > { %s5570_s26 = scalar_lea.vmem %s5856_s15, 512  ;;  %p5578_p2 = scmp.lt.s32.totalorder %s5856_s15, %s5856_s15 }
  0x26   : > { %p5571_p9 = scmp.ne.s32.totalorder %s5856_s15, %s5570_s26  ;;  %p5579_p12 = scmp.lt.s32.totalorder %s5570_s26, %s5570_s26 }
  0x28   : > { %p5573_p10 = pnand %p5571_p9, %p5559_p13  ;;  %p5580_p0 = por %p5579_p12, %p5578_p2 }
  0x2a   : > { %p5574_p1 = pneg %p5573_p10 }
  0x2c   : > { %p5581_p6 = pnand %p5580_p0, %p5574_p1 }
  0x2e   : > { %5584 = shalt.err (!%p5581_p6)
}
  0x2f   : > { %s7079_s10 = smov 128   ;;  %s7080_s14 = smov 8  }
  0x30   : > { %5324 = dma.hbm_to_vmem [thread:$0]  (!%p5863_p11), %s7100_s2, 512, %s5856_s15, [#allocation6], %s7079_s10, %s7079_s10, %s7080_s14  }
  0x31   : > { %s7101_s6 = sld [smem:[#allocation36_spill]] }
  0x37   : > { %s5585_s22 = scalar_lea.hbm %s7101_s6, 512 }
  0x38   : > { %p5586_p1 = scmp.ne.s32.totalorder %s7101_s6, %s5585_s22  ;;  %p5592_p10 = scmp.lt.u32.totalorder %s5585_s22, %s7101_s6 }
  0x3a   : > { %p5588_p2 = pnand %p5586_p1, %p5559_p13 }
  0x3c   : > { %p5589_p6 = pneg %p5588_p2 }
  0x3e   : > { %p5594_p3 = pnand %p5592_p10, %p5589_p6 }
  0x40   : > { %5597 = shalt.err (!%p5594_p3)
}
  0x41   : > { %s5598_s15 = scalar_lea.vmem %s5867_s18, 512  ;;  %p5606_p12 = scmp.lt.s32.totalorder %s5867_s18, %s5867_s18 }
  0x42   : > { %p5599_p5 = scmp.ne.s32.totalorder %s5867_s18, %s5598_s15  ;;  %p5607_p0 = scmp.lt.s32.totalorder %s5598_s15, %s5598_s15 }
  0x44   : > { %p5601_p7 = pnand %p5599_p5, %p5559_p13  ;;  %p5608_p1 = por %p5607_p0, %p5606_p12 }
  0x46   : > { %p5602_p9 = pneg %p5601_p7 }
  0x48   : > { %p5609_p2 = pnand %p5608_p1, %p5602_p9 }
  0x4a   : > { %5612 = shalt.err (!%p5609_p2)
}
  0x4b   : > { %5327 = dma.hbm_to_vmem [thread:$0]  (!%p5863_p11), %s7101_s6, 512, %s5867_s18, [#allocation9], %s7079_s10, %s7079_s10, %s7080_s14  }
  0x4c   : > { %s5928_s16 = sadd.s32 1, %s5751_s30   ;;  %s35_s20 = sadd.s32 1, %s5747_s29 }
  0x4d   : > { %7102 = sst [smem:[#allocation17_spill]] %s5928_s16  ;;  %s32_s21 = ssub.s32 %s5751_s30, %s5928_s16 }
  0x4e   : > { %p42_p13 = scmp.ne.s32.totalorder %s5747_s29, %s5743_s28  ;;  %p33_p6 = scmp.eq.s32.totalorder %s32_s21, 0 }
  0x4f   : > { %p43_p10 = scmp.eq.s32.totalorder %s5751_s30, 0  ;;  %p7103_p3 = scmp.eq.s32.totalorder %s5833_s9, 1 }
  0x50   : > { %p5341_p7 = scmp.lt.s32.totalorder %s5751_s30, 2  ;;  %s5947_s24 = sand.u32 1, %s5747_s29  }
  0x51   : > { %p5938_p5 = por %p7103_p3, %p42_p13  ;;  %p44_p9 = por %p43_p10, %p42_p13 }
  0x52   : > { %s5944_s23 = scalar_select %p33_p6, %s5747_s29, %s35_s20  }
  0x53   : > { %s7104_s22 = scalar_select %p5938_p5, 1, 0 }
  0x54   : > { %7105 = sst [smem:[#allocation18_spill]] %s5944_s23  ;;  %s4873_s18 = sshll.u32 %s5947_s24, 5 }
  0x55   : > { %s4987_s25 = sshll.u32 %s5751_s30, 9  ;;  %s7106_s0 = sld [smem:[#allocation34_spill]] }
  0x56   : > { %s292_s19 = scalar_lea.vmem [#allocation2], %s4873_s18  ;;  %p5958_p11 = pnand %p5341_p7, %p44_p9 }
  0x57   : > { %s300_s20 = sshll.u32 %s292_s19, 4  ;;  %s4877_s14 = sshll.u32 %s5947_s24, 1  ;;  %s5956_s20 = int_to_ptr.vmem [resolvable:$true] %s300_s20 }
  0x58   : > { %s289_s2 = scalar_lea.sflag [#allocation3], %s5947_s24  ;;  %p5615_p0 = pneg %p5958_p11 }
  0x5b   : > { %s5954_s17 = scalar_lea.hbm %s7106_s0, %s4987_s25  ;;  %s5618_s15 = scalar_lea.hbm %s7106_s0, 1024 }
  0x5c   : > { %s5613_s26 = scalar_lea.hbm %s5954_s17, 512  ;;  %p5619_p13 = scmp.lt.u32.totalorder %s5954_s17, %s7106_s0 }
  0x5d   : > { %p5614_p12 = scmp.ne.s32.totalorder %s5954_s17, %s5613_s26  ;;  %p5620_p6 = scmp.lt.u32.totalorder %s5618_s15, %s5613_s26 }
  0x5e   : > { %p5622_p3 = scmp.lt.u32.totalorder %s5613_s26, %s5954_s17 }
  0x5f   : > { %p5616_p1 = pnand %p5615_p0, %p5614_p12  ;;  %p5621_p10 = por %p5620_p6, %p5619_p13 }
  0x61   : > { %p5617_p2 = pneg %p5616_p1  ;;  %p5623_p7 = por %p5622_p3, %p5621_p10 }
  0x63   : > { %p5624_p9 = pnand %p5623_p7, %p5617_p2 }
  0x65   : > { %5627 = shalt.err (!%p5624_p9)
}
  0x66   : > { %s5628_s10 = scalar_lea.vmem %s5956_s20, 512  ;;  %s5757_s18 = smov [#allocation2]  }
  0x67   : > { %p5629_p12 = scmp.ne.s32.totalorder %s5956_s20, %s5628_s10  ;;  %s5633_s25 = sshll.u32 %s5757_s18, 4  ;;  %s5634_s25 = int_to_ptr.vmem [resolvable:$false] %s5633_s25 }
  0x68   : > { %s5635_s6 = scalar_lea.vmem %s5634_s25, 1024  ;;  %p5636_p4 = scmp.lt.s32.totalorder %s5956_s20, %s5634_s25 }
  0x69   : > { %p5631_p1 = pnand %p5629_p12, %p5615_p0  ;;  %p5637_p13 = scmp.lt.s32.totalorder %s5635_s6, %s5628_s10 }
  0x6b   : > { %p5632_p5 = pneg %p5631_p1  ;;  %p5638_p6 = por %p5637_p13, %p5636_p4 }
  0x6d   : > { %p5639_p10 = pnand %p5638_p6, %p5632_p5 }
  0x6f   : > { %5642 = shalt.err (!%p5639_p10)
}
  0x70   : > { %s7108_s26 = smov 8   ;;  %s7109_s15 = smov 128  }
  0x71   : > { %5331 = dma.hbm_to_vmem [thread:$0]  (!%p5958_p11), %s5954_s17, 512, %s5956_s20, %s289_s2, %s7109_s15, %s7109_s15, %s7108_s26  }
  0x72   : > { %s4988_s19 = sshll.u32 %s5751_s30, 5  ;;  %s314_s6 = scalar_lea.vmem [#allocation5], %s4877_s14 }
  0x73   : > { %s5999_s25 = scalar_lea.hbm %s7070_s1, %s4988_s19  ;;  %s321_s0 = sshll.u32 %s314_s6, 4  ;;  %s6003_s0 = int_to_ptr.vmem [resolvable:$true] %s321_s0 }
  0x74   : > { %s7110_s23 = sand.u32 1, %s5751_s30   ;;  %s5643_s16 = scalar_lea.hbm %s5999_s25, 32 }
  0x75   : > { %s6007_s29 = scalar_lea.sflag [#allocation6], %s7110_s23  ;;  %p5644_p4 = scmp.ne.s32.totalorder %s5999_s25, %s5643_s16 }
  0x76   : > { %s5648_s24 = scalar_lea.hbm %s7070_s1, 64  ;;  %p5649_p3 = scmp.lt.u32.totalorder %s5999_s25, %s7070_s1 }
  0x77   : > { %p5646_p5 = pnand %p5644_p4, %p5615_p0  ;;  %p5650_p7 = scmp.lt.u32.totalorder %s5648_s24, %s5643_s16 }
  0x78   : > { %p5652_p12 = scmp.lt.u32.totalorder %s5643_s16, %s5999_s25 }
  0x79   : > { %p5647_p2 = pneg %p5646_p5  ;;  %p5651_p9 = por %p5650_p7, %p5649_p3 }
  0x7b   : > { %p5653_p1 = por %p5652_p12, %p5651_p9 }
  0x7d   : > { %p5654_p13 = pnand %p5653_p1, %p5647_p2 }
  0x7f   : > { %5657 = shalt.err (!%p5654_p13)
}
  0x80   : > { %s5658_s14 = scalar_lea.vmem %s6003_s0, 32  ;;  %s5758_s23 = smov [#allocation5]  }
  0x81   : > { %p5659_p6 = scmp.ne.s32.totalorder %s6003_s0, %s5658_s14  ;;  %s5663_s15 = sshll.u32 %s5758_s23, 4  ;;  %s5664_s15 = int_to_ptr.vmem [resolvable:$false] %s5663_s15 }
  0x82   : > { %s5665_s19 = scalar_lea.vmem %s5664_s15, 64  ;;  %p5666_p5 = scmp.lt.s32.totalorder %s6003_s0, %s5664_s15 }
  0x83   : > { %p5661_p10 = pnand %p5659_p6, %p5615_p0  ;;  %p5667_p3 = scmp.lt.s32.totalorder %s5665_s19, %s5658_s14 }
  0x85   : > { %p5662_p4 = pneg %p5661_p10  ;;  %p5668_p7 = por %p5667_p3, %p5666_p5 }
  0x87   : > { %p5669_p9 = pnand %p5668_p7, %p5662_p4 }
  0x89   : > { %5672 = shalt.err (!%p5669_p9)
}
  0x8a   : > { %s5759_s16 = smov 16   ;;  %s5760_s18 = smov 1  }
  0x8b   : > { %5334 = dma.hbm_to_vmem [thread:$0]  (!%p5958_p11), %s5999_s25, 32, %s6003_s0, %s6007_s29, %s5759_s16, %s5759_s16, %s5760_s18  }
  0x8c   : > { %333 = sbr.rel (%p5852_p8) target bundleno = 2578 (0xa12), region = 52 }
  0x93   : > { %s6036_s10 = sand.u32 1, %s5743_s28   ;;  %p7111_p0 = scmp.ne.s32.totalorder %s7096_s11, 0 }
  0x94   : > { %s4881_s6 = sshll.u32 %s6036_s10, 5  ;;  %s336_s2 = scalar_lea.sflag [#allocation3], %s6036_s10 }
  0x95   : > { %s339_s17 = scalar_lea.vmem [#allocation2], %s4881_s6 }
  0x96   : > { %5718 = dma.done.wait (%p7111_p0), %s336_s2, 512  }
  0x97   : > { %5720 = vsyncadd (%p7111_p0), %s336_s2, 4294966784  ;;  %s344_s0 = sand.u32 1, %s5833_s9   ;;  %s4882_s29 = sshll.u32 %s6036_s10, 1 }
  0x98   : > { %s345_s13 = scalar_lea.sflag [#allocation6], %s344_s0  ;;  %s6048_s21 = scalar_lea.vmem [#allocation5], %s4882_s29 }
  0x99   : > { %5722 = dma.done.wait (%p7111_p0), %s345_s13, 32  }
  0x9a   : > { %5724 = vsyncadd (%p7111_p0), %s345_s13, 4294967264  ;;  %p7112_p8 = scmp.eq.s32.totalorder %s5833_s9, 0 }
  0x9c   : > { %5726 = dma.done.wait (%p7112_p8), [#allocation6], 512   ;;  %p7113_p11 = pmov %p7112_p8 }
  0x9d   : > { %p7114_p2 = pmov %p7112_p8 }
  0x9e   : > { %5728 = vsyncadd (%p7113_p11), [#allocation6], 4294966784 }
  0x9f   : > { %5730 = dma.done.wait (%p7114_p2), [#allocation9], 512   ;;  %p7115_p12 = pmov %p7114_p2 }
  0xa0   : > { %vm412_vm0 = vcmask 261120   ;;  %v401_v0 = vld [vmem:[#allocation7] sm:$0xff]  ;;  %v402_v1 = vld [vmem:[#allocation7 + $0x8] sm:$0xff]  ;;  %v403_v2 = vld [vmem:[#allocation7 + $0x10] sm:$0xff]  ;;  %s5761_s24 = smov 96   ;;  %s5762_s20 = smov 64  }
  0xa1   : > { %5732 = vsyncadd (%p7115_p12), [#allocation9], 4294966784  ;;  %v5291_v3 = vpack.c.bf16 %v402_v1, %v401_v0  ;;  %v404_v4 = vld [vmem:[#allocation7 + $0x18] sm:$0xff]  ;;  %v398_v7 = vld [vmem:[%s339_s17 + $0x8] sm:$0xff]  ;;  %vm988_vm1 = vcmask 64512   ;;  %s5763_s26 = smov 120  }
  0xa2   : > { %v397_v5 = vld [vmem:[%s339_s17] sm:$0xff]  ;;  %v5295_v6 = vpack.c.bf16 %v404_v4, %v403_v2  ;;  %v399_v8 = vld [vmem:[%s339_s17 + $0x10] sm:$0xff]  ;;  %v400_v9 = vld [vmem:[%s339_s17 + $0x18] sm:$0xff]  ;;  %s393_s2 = scalar_lea.vmem [#allocation10], %s4881_s6  ;;  %s4990_s0 = sshll.u32 %s5833_s9, 9 }
  0xa3   : > { %5111 = vmatprep.mubr.msk.f32.mxu0 %vm412_vm0, %v397_v5  ;;  %5292 = vmatprep.subr.bf16.mxu0 %v5291_v3  ;;  %v4886_v10 = vld [vmem:[%s7072_s3] ss:$0 sm:$0xff]  ;;  %s4753_s17 = sshll.u32 %s393_s2, 4  ;;  %s4739_s6 = scalar_lea.sflag [#allocation4], %s6036_s10  ;;  %s7018_s17 = int_to_ptr.vmem [resolvable:$true] %s4753_s17 }
  0xa4   : > { %5294 = vmatpush3.bf16.msra.mxu0 %v5291_v3  ;;  %v6157_v55 = vld [vmem:[%s6048_s21] ss:$0 sm:$0xff]  ;;  %s5673_s9 = scalar_lea.vmem %s7018_s17, 512  ;;  %p7172_p13 = scmp.ne.s32.totalorder %s7104_s22, 0 }
  0xa5   : > { %5296 = vmatprep.subr.bf16.mxu0 %v5295_v6  ;;  %p5674_p1 = scmp.ne.s32.totalorder %s7018_s17, %s5673_s9  ;;  %s5764_s11 = smov [#allocation10]  }
  0xa6   : > { %s5677_s25 = sshll.u32 %s5764_s11, 4  ;;  %s5678_s25 = int_to_ptr.vmem [resolvable:$false] %s5677_s25 }
  0xa7   : > { %p5675_p6 = pnand %p5674_p1, %p7172_p13  ;;  %p5680_p4 = scmp.lt.s32.totalorder %s7018_s17, %s5678_s25 }
  0xa8   : > { %5298 = vmatpush3.bf16.msra.mxu0 %v5295_v6 }
  0xa9   : > { %p5676_p10 = pneg %p5675_p6 }
  0xab   : > { %5112 = vmatmul.mubr.msk.f32.vlgmr.msra.gmra.mrb[0].mxu0 %vm412_vm0, %v398_v7 }
  0xac   : > { %5114 = vmatprep.mubr.msk.f32.mxu0 %vm412_vm0, %v399_v8 }
  0xaf   : > { %5115 = vmatmul.mubr.msk.f32.gmra.mrb[2].mxu0 %vm412_vm0, %v400_v9 }
 0x17e   : > { %v5113_v11 = vpop.f32.mrb[0].mxu0 }
 0x17f   : > { %v497_v12 = vadd.f32 %v5113_v11, %v4886_v10  ;;  %v491_v13 = vpop.f32.mrb[1].mxu0 }
 0x180   : > { %v492_v15 = vadd.f32 %v4886_v10, %v491_v13 }
 0x181   : > { %836 = vrot.lane.b32.xlu0 %v497_v12, %s5761_s24 }
 0x182   : > { %v5116_v14 = vpop.f32.mrb[2].mxu0 }
 0x183   : > { %v507_v16 = vadd.f32 %v5116_v14, %v4886_v10  ;;  %v501_v17 = vpop.f32.mrb[3].mxu0 }
 0x184   : > { %v502_v18 = vadd.f32 %v4886_v10, %v501_v17 }
 0x185   : > { %840 = vrot.lane.b32.xlu1 %v507_v16, %s5761_s24  ;;  %834 = vrot.lane.b32.xlu0 %v492_v15, %s5761_s24 }
 0x189   : > { %838 = vrot.lane.b32.xlu1 %v502_v18, %s5761_s24  ;;  %s5679_s24 = scalar_lea.vmem %s5678_s25, 1024 }
 0x18a   : > { %p5681_p5 = scmp.lt.s32.totalorder %s5679_s24, %s5673_s9 }
 0x18c   : > { %p5682_p3 = por %p5681_p5, %p5680_p4 }
 0x18e   : > { %p5683_p7 = pnand %p5682_p3, %p5676_p10 }
 0x1a3   : > { %510 = vxpose.xlu0.b32.start [1/2] (short) (narrow) %v492_v15, 32 }
 0x1a7   : > { %511 = vxpose.xlu0.b32.end [2/2] (short) (narrow) %v497_v12, 32 }
 0x1b2   : > { %542 = vxpose.xlu1.b32.start [1/2] (short) (narrow) %v502_v18, 32 }
 0x1b6   : > { %543 = vxpose.xlu1.b32.end [2/2] (short) (narrow) %v507_v16, 32 }
 0x1f3   : > { %v837_v19 = vpop.permute.xlu0 %836 }
 0x1f7   : > { %v835_v20 = vpop.permute.xlu0 %834  ;;  %v841_v23 = vpop.permute.xlu1 %840 }
 0x1fb   : > { %v839_v25 = vpop.permute.xlu1 %838 }
 0x223   : > { %v526_v21 = vpop.trf.xlu0 }
 0x224   : > { %574 = vxpose.xlu0.b32.start.end [1/1] (short) (narrow) %v526_v21, 16 }
 0x227   : > { %v527_v22 = vpop.trf.xlu0 }
 0x228   : > { %606 = vxpose.xlu1.b32.start.end [1/1] (short) (narrow) %v527_v22, 16 }
 0x229   : > { %846 = vxpose.xlu0.b32.start [1/2] (short) (narrow) %v835_v20, 32  ;;  %v4908_v20 = vld [vmem:[%s6048_s21 + $0x1] ss:$0 sm:$0xff]  ;;  %s7023_s21 = scalar_lea.hbm %s7077_s8, %s4990_s0 }
 0x22b   : > { %v528_v24 = vpop.trf.xlu0 }
 0x22d   : > { %847 = vxpose.xlu0.b32.end [2/2] (short) (narrow) %v837_v19, 32 }
 0x22f   : > { %v529_v26 = vpop.trf.xlu0 }
 0x230   : > { %670 = vxpose.xlu1.b32.start.end [1/1] (short) (narrow) %v529_v26, 16 }
 0x232   : > { %v558_v27 = vpop.trf.xlu1 }
 0x235   : > { %702 = vxpose.xlu1.b32.start.end [1/1] (short) (narrow) %v558_v27, 16 }
 0x236   : > { %638 = vxpose.xlu0.b32.start.end [1/1] (short) (narrow) %v528_v24, 16  ;;  %v559_v28 = vpop.trf.xlu1 }
 0x23a   : > { %734 = vxpose.xlu1.b32.start.end [1/1] (short) (narrow) %v559_v28, 16  ;;  %v560_v29 = vpop.trf.xlu1 }
 0x23b   : > { %878 = vxpose.xlu0.b32.start [1/2] (short) (narrow) %v839_v25, 32 }
 0x23e   : > { %v561_v30 = vpop.trf.xlu1 }
 0x23f   : > { %879 = vxpose.xlu0.b32.end [2/2] (short) (narrow) %v841_v23, 32  ;;  %766 = vxpose.xlu1.b32.start.end [1/1] (short) (narrow) %v560_v29, 16 }
 0x248   : > { %798 = vxpose.xlu0.b32.start.end [1/1] (short) (narrow) %v561_v30, 16 }
 0x261   : > { %910 = vrot.lane.b32.xlu1 %v492_v15, %s5762_s20 }
 0x265   : > { %914 = vrot.lane.b32.xlu1 %v502_v18, %s5762_s20 }
 0x275   : > { %912 = vrot.lane.b32.xlu0 %v497_v12, %s5762_s20 }
 0x279   : > { %916 = vrot.lane.b32.xlu0 %v507_v16, %s5762_s20 }
 0x2a4   : > { %v6069_v31 = vpop.trf.xlu0 }
 0x2a5   : > { %5119 = vmatprep.mubr.msk.f32.mxu1 %vm988_vm1, %v6069_v31 }
 0x2a8   : > { %v6073_v32 = vpop.trf.xlu0  ;;  %v6075_v33 = vpop.trf.xlu1 }
 0x2ac   : > { %v862_v34 = vpop.trf.xlu0  ;;  %v6077_v35 = vpop.trf.xlu1 }
 0x2ad   : > { %5117 = vmatprep.subr.mxu1 %v862_v34  ;;  %2594 = vrot.lane.b32.xlu1 %v862_v34, %s5763_s26 }
 0x2ae   : > { %5118 = vmatpush3.msra.mxu1 %v862_v34 }
 0x2af   : > { %5120 = vmatmul.mubr.msk.f32.vlgmr.msra.gmra.mrb[0].mxu1 %vm988_vm1, %v6073_v32 }
 0x2b0   : > { %v863_v36 = vpop.trf.xlu0  ;;  %5124 = vmatprep.mubr.msk.f32.mxu1 %vm988_vm1, %v6075_v33  ;;  %v6084_v37 = vpop.trf.xlu1 }
 0x2b1   : > { %5122 = vmatprep.subr.mxu1 %v863_v36  ;;  %2673 = vrot.lane.b32.xlu0 %v863_v36, %s5763_s26 }
 0x2b2   : > { %5123 = vmatpush3.msra.mxu1 %v863_v36 }
 0x2b3   : > { %5125 = vmatmul.mubr.msk.f32.vlgmr.msra.gmra.mrb[2].mxu1 %vm988_vm1, %v6077_v35 }
 0x2b4   : > { %v864_v38 = vpop.trf.xlu0  ;;  %v6089_v39 = vpop.trf.xlu1 }
 0x2b5   : > { %5127 = vmatprep.subr.mxu1 %v864_v38  ;;  %2752 = vrot.lane.b32.xlu1 %v864_v38, %s5763_s26 }
 0x2b6   : > { %5128 = vmatpush3.msra.mxu1 %v864_v38 }
 0x2b8   : > { %v6092_v40 = vpop.trf.xlu0  ;;  %v6094_v41 = vpop.trf.xlu1 }
 0x2b9   : > { %5132 = vmatprep.subr.mxu1 %v6092_v40 }
 0x2bc   : > { %v6097_v42 = vpop.trf.xlu0  ;;  %v6099_v43 = vpop.trf.xlu1 }
 0x2bd   : > { %5129 = vmatprep.mubr.msk.f32.mxu1 %vm988_vm1, %v6097_v42 }
 0x2c0   : > { %v6103_v44 = vpop.trf.xlu0  ;;  %v6105_v45 = vpop.trf.xlu1 }
 0x2c1   : > { %5130 = vmatmul.mubr.msk.f32.vlgmr.msra.gmra.mrb[4].mxu1 %vm988_vm1, %v6103_v44 }
 0x2c2   : > { %5133 = vmatpush3.msra.mxu1 %v6092_v40  ;;  %5134 = vmatprep.mubr.msk.f32.mxu1 %vm988_vm1, %v6084_v37 }
 0x2c4   : > { %v6112_v46 = vpop.trf.xlu0  ;;  %v6114_v47 = vpop.trf.xlu1 }
 0x2c5   : > { %5135 = vmatmul.mubr.msk.f32.vlgmr.msra.gmra.mrb[6].mxu1 %vm988_vm1, %v6089_v39  ;;  %5137 = vmatprep.subr.mxu1 %v6112_v46 }
 0x2c6   : > { %5138 = vmatpush3.msra.mxu1 %v6112_v46  ;;  %5139 = vmatprep.mubr.msk.f32.mxu1 %vm988_vm1, %v6094_v41 }
 0x2c8   : > { %v6122_v48 = vpop.trf.xlu0  ;;  %v6124_v49 = vpop.trf.xlu1 }
 0x2c9   : > { %5140 = vmatmul.mubr.msk.f32.vlgmr.msra.gmra.mrb[8].mxu1 %vm988_vm1, %v6099_v43  ;;  %5142 = vmatprep.subr.mxu1 %v6122_v48 }
 0x2ca   : > { %5143 = vmatpush3.msra.mxu1 %v6122_v48  ;;  %5144 = vmatprep.mubr.msk.f32.mxu1 %vm988_vm1, %v6105_v45 }
 0x2cb   : > { %5149 = vmatprep.mubr.msk.f32.mxu0 %vm988_vm1, %v6124_v49 }
 0x2cc   : > { %v6134_v50 = vpop.trf.xlu0  ;;  %v6136_v51 = vpop.trf.xlu1 }
 0x2cd   : > { %5145 = vmatmul.mubr.msk.f32.vlgmr.msra.gmra.mrb[10].mxu1 %vm988_vm1, %v6114_v47  ;;  %5147 = vmatprep.subr.mxu0 %v6134_v50 }
 0x2ce   : > { %5148 = vmatpush3.msra.mxu0 %v6134_v50 }
 0x2cf   : > { %5150 = vmatmul.mubr.msk.f32.vlgmr.msra.gmra.mrb[4].mxu0 %vm988_vm1, %v6136_v51 }
 0x2d0   : > { %v6144_v52 = vpop.trf.xlu0 }
 0x2d1   : > { %5152 = vmatprep.subr.mxu1 %v6144_v52 }
 0x2d2   : > { %5153 = vmatpush3.msra.mxu1 %v6144_v52 }
 0x2d4   : > { %v6148_v53 = vpop.trf.xlu0 }
 0x2d5   : > { %5154 = vmatprep.mubr.msk.f32.mxu1 %vm988_vm1, %v6148_v53 }
 0x2d8   : > { %v6152_v54 = vpop.trf.xlu0 }
 0x2d9   : > { %5155 = vmatmul.mubr.msk.f32.vlgmr.msra.gmra.mrb[12].mxu1 %vm988_vm1, %v6152_v54 }
 0x382   : > { %v5121_v56 = vpop.f32.mrb[0].mxu1 }
 0x383   : > { %v6160_v57 = vadd.f32 %v5121_v56, %v6157_v55  ;;  %v1061_v58 = vpop.f32.mrb[1].mxu1 }
 0x384   : > { %v6163_v59 = vadd.f32 %v6157_v55, %v1061_v58 }
 0x385   : > { %v1668_v60 = vsel %vm988_vm1, %v6160_v57, -inf }
 0x386   : > { %1669 = vmax.xlane.f32.xlu0 %v1668_v60  ;;  %v5126_v61 = vpop.f32.mrb[2].mxu1  ;;  %v1665_v62 = vsel %vm988_vm1, %v6163_v59, -inf }
 0x387   : > { %v6170_v63 = vadd.f32 %v5126_v61, %v6157_v55  ;;  %1666 = vmax.xlane.f32.xlu1 %v1665_v62  ;;  %v1142_v0 = vpop.f32.mrb[3].mxu1 }
 0x388   : > { %v6175_v2 = vadd.f32 %v6157_v55, %v1142_v0 }
 0x389   : > { %v1674_v1 = vsel %vm988_vm1, %v6170_v63, -inf }
 0x38a   : > { %v1671_v3 = vsel %vm988_vm1, %v6175_v2, -inf }
 0x38b   : > { %1675 = vmax.xlane.f32.xlu1 %v1674_v1 }
 0x38f   : > { %1672 = vmax.xlane.f32.xlu1 %v1671_v3  ;;  %v911_v3 = vpop.permute.xlu1 %910 }
 0x394   : > { %v5131_v4 = vpop.f32.mrb[4].mxu1 }
 0x395   : > { %v6180_v5 = vadd.f32 %v5131_v4, %v6157_v55  ;;  %v1223_v6 = vpop.f32.mrb[5].mxu1  ;;  %v913_v4 = vpop.permute.xlu0 %912 }
 0x396   : > { %v6183_v7 = vadd.f32 %v6157_v55, %v1223_v6  ;;  %v915_v6 = vpop.permute.xlu1 %914 }
 0x397   : > { %v1680_v8 = vsel %vm988_vm1, %v6180_v5, -inf }
 0x398   : > { %1681 = vmax.xlane.f32.xlu0 %v1680_v8  ;;  %v5136_v9 = vpop.f32.mrb[6].mxu1  ;;  %v1677_v10 = vsel %vm988_vm1, %v6183_v7, -inf }
 0x399   : > { %v6190_v11 = vadd.f32 %v5136_v9, %v6157_v55  ;;  %1678 = vmax.xlane.f32.xlu1 %v1677_v10  ;;  %v1304_v12 = vpop.f32.mrb[7].mxu1  ;;  %v917_v8 = vpop.permute.xlu0 %916 }
 0x39a   : > { %v6193_v13 = vadd.f32 %v6157_v55, %v1304_v12  ;;  %v6240_v9 = vpop.permute.xlu1 %2594 }
 0x39b   : > { %v1686_v14 = vsel %vm988_vm1, %v6190_v11, -inf }
 0x39c   : > { %1687 = vmax.xlane.f32.xlu0 %v1686_v14  ;;  %v5141_v15 = vpop.f32.mrb[8].mxu1  ;;  %v1683_v16 = vsel %vm988_vm1, %v6193_v13, -inf }
 0x39d   : > { %1684 = vmax.xlane.f32.xlu1 %v1683_v16  ;;  %v1385_v17 = vpop.f32.mrb[9].mxu1  ;;  %v6204_v25 = vadd.f32 %v5141_v15, %v4908_v20 }
 0x39e   : > { %v6208_v27 = vadd.f32 %v4908_v20, %v1385_v17 }
 0x39f   : > { %v1692_v30 = vsel %vm988_vm1, %v6204_v25, -inf }
 0x3a0   : > { %v5146_v18 = vpop.f32.mrb[10].mxu1  ;;  %v1689_v36 = vsel %vm988_vm1, %v6208_v27, -inf }
 0x3a1   : > { %v1466_v19 = vpop.f32.mrb[11].mxu1  ;;  %v6212_v29 = vadd.f32 %v5146_v18, %v4908_v20  ;;  %v6265_v18 = vpop.permute.xlu0 %2673 }
 0x3a2   : > { %v5151_v21 = vpop.f32.mrb[4].mxu0  ;;  %v6216_v34 = vadd.f32 %v4908_v20, %v1466_v19 }
 0x3a3   : > { %v6200_v22 = vadd.f32 %v5151_v21, %v4908_v20  ;;  %v1547_v23 = vpop.f32.mrb[5].mxu0  ;;  %v1698_v56 = vsel %vm988_vm1, %v6212_v29, -inf }
 0x3a4   : > { %v6202_v24 = vadd.f32 %v4908_v20, %v1547_v23  ;;  %v1695_v61 = vsel %vm988_vm1, %v6216_v34, -inf }
 0x3a5   : > { %v1704_v26 = vsel %vm988_vm1, %v6200_v22, -inf }
 0x3a6   : > { %1705 = vmax.xlane.f32.xlu0 %v1704_v26  ;;  %v1701_v28 = vsel %vm988_vm1, %v6202_v24, -inf }
 0x3a7   : > { %1702 = vmax.xlane.f32.xlu1 %v1701_v28 }
 0x3aa   : > { %1693 = vmax.xlane.f32.xlu0 %v1692_v30 }
 0x3ab   : > { %1690 = vmax.xlane.f32.xlu1 %v1689_v36 }
 0x3ac   : > { %v5156_v38 = vpop.f32.mrb[12].mxu1 }
 0x3ad   : > { %v6222_v58 = vadd.f32 %v5156_v38, %v4908_v20  ;;  %v1628_v60 = vpop.f32.mrb[13].mxu1 }
 0x3ae   : > { %1699 = vmax.xlane.f32.xlu0 %v1698_v56  ;;  %v6226_v62 = vadd.f32 %v4908_v20, %v1628_v60 }
 0x3af   : > { %1696 = vmax.xlane.f32.xlu1 %v1695_v61  ;;  %v1710_v0 = vsel %vm988_vm1, %v6222_v58, -inf }
 0x3b0   : > { %v1707_v1 = vsel %vm988_vm1, %v6226_v62, -inf }
 0x3b2   : > { %1711 = vmax.xlane.f32.xlu0 %v1710_v0 }
 0x3b3   : > { %1708 = vmax.xlane.f32.xlu1 %v1707_v1 }
 0x3c8   : > { %2831 = vrot.lane.b32.xlu0 %v6092_v40, %s5763_s26  ;;  %v6242_v40 = vpop.permute.xlu1 %2752 }
 0x3cc   : > { %2910 = vrot.lane.b32.xlu0 %v6112_v46, %s5763_s26 }
 0x3d0   : > { %2989 = vrot.lane.b32.xlu0 %v6122_v48, %s5763_s26 }
 0x3d4   : > { %3068 = vrot.lane.b32.xlu0 %v6134_v50, %s5763_s26 }
 0x3e6   : > { %922 = vxpose.xlu1.b32.start [1/2] (short) (narrow) %v911_v3, 32 }
 0x3ea   : > { %923 = vxpose.xlu1.b32.end [2/2] (short) (narrow) %v913_v4, 32 }
 0x3f2   : > { %954 = vxpose.xlu0.b32.start [1/2] (short) (narrow) %v915_v6, 32 }
 0x3f6   : > { %955 = vxpose.xlu0.b32.end [2/2] (short) (narrow) %v917_v8, 32 }
 0x410   : > { %3147 = vrot.lane.b32.xlu1 %v6144_v52, %s5763_s26 }
 0x413   : > { %v1670_v19 = vpop.xlane.xlu0 %1669 }
 0x414   : > { %v1667_v46 = vpop.xlane.xlu1 %1666  ;;  %3227 = vrot.lane.b32.xlu1 %v4908_v20, %s5763_s26  ;;  %v6267_v38 = vmax.f32 %v1670_v19, -1e+30 }
 0x415   : > { %v6247_v48 = vmax.f32 %v1667_v46, -1e+30 }
 0x416   : > { %v1730_v61 = vsub.f32 %v6160_v57, %v6267_v38 }
 0x417   : > { %v1729_v50 = vsub.f32 %v6163_v59, %v6247_v48 }
 0x418   : > { %v1676_v10 = vpop.xlane.xlu1 %1675  ;;  %v1747_v4 = vmul.f32 1.442695, %v1730_v61 }
 0x419   : > { %v1745_v12 = vmul.f32 1.442695, %v1729_v50  ;;  %v6273_v0 = vmax.f32 %v1676_v10, -1e+30 }
 0x41b   : > { %5389 = vpow2.f32 %v1745_v12  ;;  %v1732_v6 = vsub.f32 %v6170_v63, %v6273_v0 }
 0x41c   : > { %v1673_v14 = vpop.xlane.xlu1 %1672 }
 0x41d   : > { %v6251_v15 = vmax.f32 %v1673_v14, -1e+30 }
 0x41f   : > { %v1731_v16 = vsub.f32 %v6175_v2, %v6251_v15 }
 0x421   : > { %v1749_v17 = vmul.f32 1.442695, %v1731_v16 }
 0x423   : > { %5391 = vpow2.f32 %v1749_v17 }
 0x424   : > { %5393 = vpow2.f32 %v1747_v4 }
 0x425   : > { %v6255_v52 = vpop.eup %5389  ;;  %v1682_v20 = vpop.xlane.xlu0 %1681 }
 0x426   : > { %5159 = vmatprep.mubr.msk.f32.mxu0 %vm988_vm1, %v6255_v52  ;;  %v1679_v23 = vpop.xlane.xlu1 %1678  ;;  %v6281_v8 = vmax.f32 %v1682_v20, -1e+30 }
 0x427   : > { %3225 = vrot.lane.b32.xlu0 %v6157_v55, %s5763_s26  ;;  %v6269_v56 = vmax.f32 %v1679_v23, -1e+30 }
 0x428   : > { %v1734_v16 = vsub.f32 %v6180_v5, %v6281_v8 }
 0x429   : > { %v1688_v2 = vpop.xlane.xlu0 %1687  ;;  %v1733_v1 = vsub.f32 %v6183_v7, %v6269_v56  ;;  %v1751_v7 = vmul.f32 1.442695, %v1732_v6 }
 0x42a   : > { %v1685_v28 = vpop.xlane.xlu1 %1684  ;;  %v6289_v14 = vmax.f32 %v1688_v2, -1e+30 }
 0x42b   : > { %v6277_v3 = vmax.f32 %v1685_v28, -1e+30  ;;  %v1753_v12 = vmul.f32 1.442695, %v1733_v1 }
 0x42c   : > { %v1736_v2 = vsub.f32 %v6190_v11, %v6289_v14 }
 0x42d   : > { %v6261_v59 = vpop.eup %5391  ;;  %v1735_v57 = vsub.f32 %v6193_v13, %v6277_v3  ;;  %5395 = vpow2.f32 %v1753_v12 }
 0x42e   : > { %5164 = vmatprep.mubr.msk.f32.mxu1 %vm988_vm1, %v6261_v59  ;;  %5397 = vpow2.f32 %v1751_v7  ;;  %v1759_v6 = vmul.f32 1.442695, %v1736_v2  ;;  %v6326_v12 = vpop.eup %5393 }
 0x42f   : > { %v1757_v63 = vmul.f32 1.442695, %v1735_v57 }
 0x431   : > { %5399 = vpow2.f32 %v1757_v63 }
 0x433   : > { %v1706_v21 = vpop.xlane.xlu0 %1705 }
 0x434   : > { %v1703_v30 = vpop.xlane.xlu1 %1702  ;;  %v6317_v11 = vmax.f32 %v1706_v21, -1e+30 }
 0x435   : > { %v6293_v17 = vmax.f32 %v1703_v30, -1e+30 }
 0x437   : > { %v1694_v26 = vpop.xlane.xlu0 %1693  ;;  %v1741_v5 = vsub.f32 %v6202_v24, %v6293_v17 }
 0x438   : > { %v1691_v55 = vpop.xlane.xlu1 %1690  ;;  %v6295_v19 = vmax.f32 %v1694_v26, -1e+30 }
 0x439   : > { %v6287_v10 = vmax.f32 %v1691_v55, -1e+30  ;;  %v1755_v55 = vmul.f32 1.442695, %v1734_v16  ;;  %v1769_v24 = vmul.f32 1.442695, %v1741_v5  ;;  %v6328_v16 = vpop.eup %5395 }
 0x43a   : > { %v1738_v26 = vsub.f32 %v6204_v25, %v6295_v19 }
 0x43b   : > { %v1700_v36 = vpop.xlane.xlu0 %1699  ;;  %v1737_v20 = vsub.f32 %v6208_v27, %v6287_v10  ;;  %5401 = vpow2.f32 %v1755_v55 }
 0x43c   : > { %v1697_v46 = vpop.xlane.xlu1 %1696  ;;  %v6307_v30 = vmax.f32 %v1700_v36, -1e+30 }
 0x43d   : > { %v6299_v23 = vmax.f32 %v1697_v46, -1e+30  ;;  %v1761_v61 = vmul.f32 1.442695, %v1737_v20  ;;  %v1763_v46 = vmul.f32 1.442695, %v1738_v26  ;;  %v6341_v20 = vpop.eup %5397 }
 0x43e   : > { %v1740_v36 = vsub.f32 %v6212_v29, %v6307_v30  ;;  %v1742_v29 = vsub.f32 %v6200_v22, %v6317_v11  ;;  %v6345_v22 = vpop.eup %5399 }
 0x43f   : > { %v1712_v60 = vpop.xlane.xlu0 %1711  ;;  %v1739_v1 = vsub.f32 %v6216_v34, %v6299_v23  ;;  %5403 = vpow2.f32 %v1761_v61 }
 0x440   : > { %v1709_v13 = vpop.xlane.xlu1 %1708  ;;  %5405 = vpow2.f32 %v1759_v6  ;;  %v1767_v21 = vmul.f32 1.442695, %v1740_v36  ;;  %v6335_v63 = vmax.f32 %v1712_v60, -1e+30  ;;  %v1771_v60 = vmul.f32 1.442695, %v1742_v29 }
 0x441   : > { %v6311_v27 = vmax.f32 %v1709_v13, -1e+30  ;;  %v1765_v57 = vmul.f32 1.442695, %v1739_v1  ;;  %5407 = vpow2.f32 %v1769_v24 }
 0x442   : > { %5409 = vpow2.f32 %v1763_v46  ;;  %v1744_v55 = vsub.f32 %v6222_v58, %v6335_v63 }
 0x443   : > { %v6283_v50 = vpop.permute.xlu0 %2831  ;;  %v1743_v34 = vsub.f32 %v6226_v62, %v6311_v27  ;;  %5411 = vpow2.f32 %v1765_v57 }
 0x444   : > { %5413 = vpow2.f32 %v1767_v21  ;;  %v1775_v58 = vmul.f32 1.442695, %v1744_v55 }
 0x445   : > { %v1773_v62 = vmul.f32 1.442695, %v1743_v34  ;;  %v6356_v5 = vpop.eup %5401 }
 0x447   : > { %v6301_v28 = vpop.permute.xlu0 %2910  ;;  %5415 = vpow2.f32 %v1773_v62 }
 0x448   : > { %5417 = vpow2.f32 %v1771_v60 }
 0x449   : > { %v6361_v1 = vpop.eup %5403  ;;  %5419 = vpow2.f32 %v1775_v58 }
 0x44b   : > { %v6321_v25 = vpop.permute.xlu0 %2989 }
 0x44f   : > { %v6343_v13 = vpop.permute.xlu0 %3068 }
 0x466   : > { %v938_v4 = vpop.trf.xlu1 }
 0x467   : > { %5157 = vmatprep.subr.msk.mxu0 %vm988_vm1, %v938_v4  ;;  %3503 = vrot.lane.b32.xlu1 %v938_v4, %s5763_s26 }
 0x468   : > { %5158 = vmatpush3.xpose.msk.msra.mxu0 %vm988_vm1, %v938_v4  ;;  %v6365_v4 = vpop.eup %5405 }
 0x469   : > { %v6370_v6 = vpop.eup %5407 }
 0x46a   : > { %v939_v7 = vpop.trf.xlu1  ;;  %v6374_v36 = vpop.eup %5409 }
 0x46b   : > { %5160 = vmatmul.mubr.msk.f32.vlgmr.msra.gmra.mrb[6].mxu0 %vm988_vm1, %v6326_v12  ;;  %5162 = vmatprep.subr.msk.mxu1 %vm988_vm1, %v939_v7  ;;  %v6379_v46 = vpop.eup %5411 }
 0x46c   : > { %5163 = vmatpush3.xpose.msk.msra.mxu1 %vm988_vm1, %v939_v7  ;;  %5169 = vmatprep.mubr.msk.f32.mxu0 %vm988_vm1, %v6328_v16  ;;  %v6388_v34 = vpop.eup %5413 }
 0x46d   : > { %3588 = vrot.lane.b32.xlu0 %v939_v7, %s5763_s26  ;;  %v6393_v7 = vpop.eup %5415 }
 0x46e   : > { %v940_v2 = vpop.trf.xlu1  ;;  %v6404_v29 = vpop.eup %5417 }
 0x46f   : > { %5165 = vmatmul.mubr.msk.f32.vlgmr.msra.gmra.mrb[14].mxu1 %vm988_vm1, %v6341_v20  ;;  %5167 = vmatprep.subr.msk.mxu0 %vm988_vm1, %v940_v2  ;;  %v6418_v62 = vpop.eup %5419 }
 0x470   : > { %5174 = vmatprep.mubr.msk.f32.mxu1 %vm988_vm1, %v6345_v22  ;;  %5168 = vmatpush3.xpose.msk.msra.mxu0 %vm988_vm1, %v940_v2 }
 0x471   : > { %3673 = vrot.lane.b32.xlu1 %v940_v2, %s5763_s26 }
 0x472   : > { %v941_v26 = vpop.trf.xlu1  ;;  %v970_v61 = vpop.trf.xlu0 }
 0x473   : > { %5170 = vmatmul.mubr.msk.f32.vlgmr.msra.gmra.mrb[8].mxu0 %vm988_vm1, %v6356_v5  ;;  %5172 = vmatprep.subr.msk.mxu1 %vm988_vm1, %v941_v26 }
 0x474   : > { %5177 = vmatprep.subr.msk.mxu0 %vm988_vm1, %v970_v61  ;;  %5173 = vmatpush3.xpose.msk.msra.mxu1 %vm988_vm1, %v941_v26 }
 0x475   : > { %5178 = vmatpush3.xpose.msk.msra.mxu0 %vm988_vm1, %v970_v61  ;;  %5179 = vmatprep.mubr.msk.f32.mxu0 %vm988_vm1, %v6361_v1 }
 0x476   : > { %v971_v24 = vpop.trf.xlu0  ;;  %3758 = vrot.lane.b32.xlu1 %v941_v26, %s5763_s26  ;;  %3843 = vrot.lane.b32.xlu0 %v970_v61, %s5763_s26 }
 0x477   : > { %5175 = vmatmul.mubr.msk.f32.vlgmr.msra.gmra.mrb[16].mxu1 %vm988_vm1, %v6365_v4  ;;  %5182 = vmatprep.subr.msk.mxu1 %vm988_vm1, %v971_v24 }
 0x478   : > { %5180 = vmatmul.mubr.msk.f32.vlgmr.msra.gmra.mrb[10].mxu0 %vm988_vm1, %v6374_v36  ;;  %5183 = vmatpush3.xpose.msk.msra.mxu1 %vm988_vm1, %v971_v24 }
 0x479   : > { %5184 = vmatprep.mubr.msk.f32.mxu1 %vm988_vm1, %v6379_v46  ;;  %5189 = vmatprep.mubr.msk.f32.mxu0 %vm988_vm1, %v6370_v6 }
 0x47a   : > { %v6390_v57 = vpop.trf.xlu0  ;;  %3928 = vrot.lane.b32.xlu1 %v971_v24, %s5763_s26 }
 0x47b   : > { %5185 = vmatmul.mubr.msk.f32.vlgmr.msra.gmra.mrb[18].mxu1 %vm988_vm1, %v6388_v34  ;;  %5187 = vmatprep.subr.msk.mxu0 %vm988_vm1, %v6390_v57 }
 0x47c   : > { %5188 = vmatpush3.xpose.msk.msra.mxu0 %vm988_vm1, %v6390_v57  ;;  %5194 = vmatprep.mubr.msk.f32.mxu1 %vm988_vm1, %v6393_v7 }
 0x47d   : > { %5197 = vmatprep.subr.mxu0 %v6240_v9 }
 0x47e   : > { %v6406_v21 = vpop.trf.xlu0 }
 0x47f   : > { %5190 = vmatmul.mubr.msk.f32.vlgmr.msra.gmra.mrb[12].mxu0 %vm988_vm1, %v6404_v29  ;;  %5192 = vmatprep.subr.msk.mxu1 %vm988_vm1, %v6406_v21 }
 0x480   : > { %5193 = vmatpush3.xpose.msk.msra.mxu1 %vm988_vm1, %v6406_v21  ;;  %5198 = vmatpush3.msra.mxu0 %v6240_v9 }
 0x481   : > { %5199 = vmatprep.mubr.msk.f32.mxu0 %vm988_vm1, %v6069_v31  ;;  %5202 = vmatprep.subr.mxu1 %v6265_v18 }
 0x482   : > { %5207 = vmatprep.subr.mxu0 %v6242_v40  ;;  %v3148_v31 = vpop.permute.xlu1 %3147 }
 0x483   : > { %5195 = vmatmul.mubr.msk.f32.vlgmr.msra.gmra.mrb[20].mxu1 %vm988_vm1, %v6418_v62  ;;  %5200 = vmatmul.mubr.msk.f32.vlgmr.msra.gmra.mrb[14].mxu0 %vm988_vm1, %v6073_v32 }
 0x484   : > { %5208 = vmatpush3.msra.mxu0 %v6242_v40  ;;  %5203 = vmatpush3.msra.mxu1 %v6265_v18 }
 0x485   : > { %5204 = vmatprep.mubr.msk.f32.mxu1 %vm988_vm1, %v6075_v33  ;;  %5209 = vmatprep.mubr.msk.f32.mxu0 %vm988_vm1, %v6097_v42 }
 0x486   : > { %5217 = vmatprep.subr.mxu0 %v6301_v28  ;;  %5212 = vmatprep.subr.mxu1 %v6283_v50  ;;  %v6463_v32 = vpop.permute.xlu1 %3227 }
 0x487   : > { %5205 = vmatmul.mubr.msk.f32.vlgmr.msra.gmra.mrb[22].mxu1 %vm988_vm1, %v6077_v35  ;;  %5210 = vmatmul.mubr.msk.f32.vlgmr.msra.gmra.mrb[16].mxu0 %vm988_vm1, %v6103_v44 }
 0x488   : > { %5213 = vmatpush3.msra.mxu1 %v6283_v50  ;;  %5218 = vmatpush3.msra.mxu0 %v6301_v28 }
 0x489   : > { %5214 = vmatprep.mubr.msk.f32.mxu1 %vm988_vm1, %v6084_v37  ;;  %5219 = vmatprep.mubr.msk.f32.mxu0 %vm988_vm1, %v6094_v41 }
 0x48a   : > { %5222 = vmatprep.subr.mxu1 %v6321_v25  ;;  %5227 = vmatprep.subr.mxu0 %v6343_v13 }
 0x48b   : > { %5215 = vmatmul.mubr.msk.f32.vlgmr.msra.gmra.mrb[24].mxu1 %vm988_vm1, %v6089_v39  ;;  %5220 = vmatmul.mubr.msk.f32.vlgmr.msra.gmra.mrb[18].mxu0 %vm988_vm1, %v6099_v43 }
 0x48c   : > { %5223 = vmatpush3.msra.mxu1 %v6321_v25  ;;  %5228 = vmatpush3.msra.mxu0 %v6343_v13 }
 0x48d   : > { %5224 = vmatprep.mubr.msk.f32.mxu1 %vm988_vm1, %v6105_v45  ;;  %5229 = vmatprep.mubr.msk.f32.mxu0 %vm988_vm1, %v6124_v49 }
 0x48e   : > { %5232 = vmatprep.subr.mxu1 %v3148_v31 }
 0x48f   : > { %5225 = vmatmul.mubr.msk.f32.vlgmr.msra.gmra.mrb[26].mxu1 %vm988_vm1, %v6114_v47  ;;  %5230 = vmatmul.mubr.msk.f32.vlgmr.msra.gmra.mrb[20].mxu0 %vm988_vm1, %v6136_v51 }
 0x490   : > { %5233 = vmatpush3.msra.mxu1 %v3148_v31  ;;  %5234 = vmatprep.mubr.msk.f32.mxu1 %vm988_vm1, %v6148_v53 }
 0x493   : > { %5235 = vmatmul.mubr.msk.f32.vlgmr.msra.gmra.mrb[28].mxu1 %vm988_vm1, %v6152_v54 }
 0x499   : > { %v3226_v35 = vpop.permute.xlu0 %3225 }
 0x4d9   : > { %v3504_v33 = vpop.permute.xlu1 %3503 }
 0x4da   : > { %5237 = vmatprep.subr.msk.mxu0 %vm988_vm1, %v3504_v33 }
 0x4db   : > { %5238 = vmatpush3.xpose.msk.msra.mxu0 %vm988_vm1, %v3504_v33 }
 0x4df   : > { %v3589_v37 = vpop.permute.xlu0 %3588 }
 0x4e0   : > { %5242 = vmatprep.subr.msk.mxu1 %vm988_vm1, %v3589_v37 }
 0x4e1   : > { %5243 = vmatpush3.xpose.msk.msra.mxu1 %vm988_vm1, %v3589_v37 }
 0x4e3   : > { %v6469_v39 = vpop.permute.xlu1 %3673 }
 0x4e4   : > { %7116 = vst [vmem:[#allocation19_spill] sm:$0xff] %v6469_v39  ;;  %5247 = vmatprep.subr.msk.mxu0 %vm988_vm1, %v6469_v39 }
 0x4e8   : > { %v6473_v41 = vpop.permute.xlu1 %3758 }
 0x4e9   : > { %7117 = vst [vmem:[#allocation20_spill] sm:$0xff] %v6473_v41  ;;  %5252 = vmatprep.subr.msk.mxu1 %vm988_vm1, %v6473_v41 }
 0x53e   : > { %v6477_v42 = vpop.f32.mrb[6].mxu0 }
 0x53f   : > { %v6479_v43 = vpop.f32.mrb[7].mxu0 }
 0x542   : > { %v6481_v44 = vpop.f32.mrb[14].mxu1 }
 0x543   : > { %v6483_v45 = vpop.f32.mrb[15].mxu1 }
 0x546   : > { %v6485_v47 = vpop.f32.mrb[8].mxu0 }
 0x547   : > { %v6487_v49 = vpop.f32.mrb[9].mxu0 }
 0x54a   : > { %v6489_v51 = vpop.f32.mrb[16].mxu1 }
 0x54b   : > { %7118 = vst [vmem:[#allocation21_spill] sm:$0xff] %v6489_v51  ;;  %v6491_v53 = vpop.f32.mrb[10].mxu0  ;;  %v6493_v54 = vpop.f32.mrb[17].mxu1 }
 0x54c   : > { %7119 = vst [vmem:[#allocation22_spill] sm:$0xff] %v6491_v53  ;;  %7120 = vst [vmem:[#allocation23_spill] sm:$0xff] %v6493_v54  ;;  %v6495_v9 = vpop.f32.mrb[11].mxu0 }
 0x54d   : > { %7121 = vst [vmem:[#allocation24_spill] sm:$0xff] %v6495_v9 }
 0x54e   : > { %v6497_v40 = vpop.f32.mrb[18].mxu1 }
 0x54f   : > { %7122 = vst [vmem:[#allocation25_spill] sm:$0xff] %v6497_v40  ;;  %v6499_v18 = vpop.f32.mrb[19].mxu1 }
 0x550   : > { %7123 = vst [vmem:[#allocation26_spill] sm:$0xff] %v6499_v18 }
 0x552   : > { %v6501_v50 = vpop.f32.mrb[12].mxu0 }
 0x553   : > { %7124 = vst [vmem:[#allocation27_spill] sm:$0xff] %v6501_v50  ;;  %v6503_v28 = vpop.f32.mrb[13].mxu0 }
 0x554   : > { %7125 = vst [vmem:[#allocation28_spill] sm:$0xff] %v6503_v28 }
 0x556   : > { %v6505_v25 = vpop.f32.mrb[20].mxu1  ;;  %v5201_v13 = vpop.f32.mrb[14].mxu0 }
 0x557   : > { %7126 = vst [vmem:[#allocation29_spill] sm:$0xff] %v6505_v25  ;;  %v6507_v2 = vadd.f32 %v5201_v13, %v3226_v35  ;;  %v6509_v60 = vpop.f32.mrb[21].mxu1  ;;  %v2663_v55 = vpop.f32.mrb[15].mxu0 }
 0x558   : > { %7127 = vst [vmem:[#allocation30_spill] sm:$0xff] %v6509_v60  ;;  %v6511_v26 = vadd.f32 %v3226_v35, %v2663_v55 }
 0x559   : > { %v3250_v61 = vsel %vm988_vm1, %v6507_v2, -inf }
 0x55a   : > { %v5206_v58 = vpop.f32.mrb[22].mxu1  ;;  %v5211_v24 = vpop.f32.mrb[16].mxu0  ;;  %3251 = vmax.xlane.f32.xlu0 %v3250_v61  ;;  %v3247_v31 = vsel %vm988_vm1, %v6511_v26, -inf }
 0x55b   : > { %v6517_v33 = vadd.f32 %v5206_v58, %v3226_v35  ;;  %v6519_v37 = vadd.f32 %v5211_v24, %v3226_v35  ;;  %v2742_v13 = vpop.f32.mrb[23].mxu1  ;;  %v2821_v28 = vpop.f32.mrb[17].mxu0  ;;  %3248 = vmax.xlane.f32.xlu1 %v3247_v31 }
 0x55c   : > { %v6525_v18 = vadd.f32 %v3226_v35, %v2742_v13  ;;  %v6534_v41 = vadd.f32 %v3226_v35, %v2821_v28 }
 0x55d   : > { %v3262_v55 = vsel %vm988_vm1, %v6519_v37, -inf  ;;  %v3256_v60 = vsel %vm988_vm1, %v6517_v33, -inf }
 0x55e   : > { %v5216_v25 = vpop.f32.mrb[24].mxu1  ;;  %v5221_v61 = vpop.f32.mrb[18].mxu0  ;;  %3263 = vmax.xlane.f32.xlu0 %v3262_v55  ;;  %v3253_v13 = vsel %vm988_vm1, %v6525_v18, -inf  ;;  %v3259_v28 = vsel %vm988_vm1, %v6534_v41, -inf }
 0x55f   : > { %v6527_v9 = vadd.f32 %v5216_v25, %v3226_v35  ;;  %v2900_v58 = vpop.f32.mrb[25].mxu1  ;;  %v2979_v50 = vpop.f32.mrb[19].mxu0  ;;  %3257 = vmax.xlane.f32.xlu1 %v3256_v60  ;;  %v6530_v24 = vadd.f32 %v5221_v61, %v6463_v32 }
 0x560   : > { %v6543_v61 = vadd.f32 %v3226_v35, %v2900_v58 }
 0x561   : > { %v3268_v31 = vsel %vm988_vm1, %v6527_v9, -inf  ;;  %v3274_v60 = vsel %vm988_vm1, %v6530_v24, -inf }
 0x562   : > { %v5226_v40 = vpop.f32.mrb[26].mxu1  ;;  %v5231_v54 = vpop.f32.mrb[20].mxu0  ;;  %3269 = vmax.xlane.f32.xlu0 %v3268_v31  ;;  %v3265_v35 = vsel %vm988_vm1, %v6543_v61, -inf }
 0x563   : > { %v3058_v55 = vpop.f32.mrb[27].mxu1  ;;  %v3137_v25 = vpop.f32.mrb[21].mxu0  ;;  %3254 = vmax.xlane.f32.xlu1 %v3253_v13  ;;  %v6539_v39 = vadd.f32 %v5226_v40, %v6463_v32  ;;  %v6548_v51 = vadd.f32 %v5231_v54, %v6463_v32  ;;  %v6553_v40 = vadd.f32 %v6463_v32, %v2979_v50 }
 0x564   : > { %v6563_v54 = vadd.f32 %v6463_v32, %v3058_v55 }
 0x565   : > { %v3280_v13 = vsel %vm988_vm1, %v6539_v39, -inf }
 0x566   : > { %v5236_v53 = vpop.f32.mrb[28].mxu1  ;;  %3275 = vmax.xlane.f32.xlu0 %v3274_v60  ;;  %v3286_v60 = vsel %vm988_vm1, %v6548_v51, -inf }
 0x567   : > { %v3216_v31 = vpop.f32.mrb[29].mxu1  ;;  %3260 = vmax.xlane.f32.xlu1 %v3259_v28  ;;  %v6558_v58 = vadd.f32 %v5236_v53, %v6463_v32  ;;  %v3271_v28 = vsel %vm988_vm1, %v6553_v40, -inf  ;;  %v3277_v53 = vsel %vm988_vm1, %v6563_v54, -inf }
 0x569   : > { %v3292_v50 = vsel %vm988_vm1, %v6558_v58, -inf }
 0x56a   : > { %3281 = vmax.xlane.f32.xlu0 %v3280_v13  ;;  %v6570_v13 = vadd.f32 %v6463_v32, %v3137_v25  ;;  %v1841_v25 = vsel %vm988_vm1, %v6255_v52, 0.0  ;;  %v1853_v52 = vsel %vm988_vm1, %v6328_v16, 0.0  ;;  %v1862_v16 = vsel %vm988_vm1, %v6365_v4, 0.0 }
 0x56b   : > { %3266 = vmax.xlane.f32.xlu1 %v3265_v35  ;;  %v6575_v35 = vadd.f32 %v6463_v32, %v3216_v31  ;;  %v1847_v32 = vsel %vm988_vm1, %v6261_v59, 0.0  ;;  %v1850_v31 = vsel %vm988_vm1, %v6341_v20, 0.0  ;;  %v1856_v59 = vsel %vm988_vm1, %v6356_v5, 0.0 }
 0x56c   : > { %v3283_v55 = vsel %vm988_vm1, %v6570_v13, -inf  ;;  %v1859_v20 = vsel %vm988_vm1, %v6345_v22, 0.0  ;;  %v1874_v5 = vsel %vm988_vm1, %v6388_v34, 0.0  ;;  %v1877_v22 = vsel %vm988_vm1, %v6370_v6, 0.0 }
 0x56d   : > { %7128 = vst [vmem:[#allocation31_spill] sm:$0xff] %v6575_v35  ;;  %v1886_v4 = vsel %vm988_vm1, %v6418_v62, 0.0  ;;  %v1777_v34 = vsub.f32 -1e+30, %v6247_v48  ;;  %v1779_v6 = vsub.f32 -1e+30, %v6251_v15 }
 0x56e   : > { %3287 = vmax.xlane.f32.xlu0 %v3286_v60  ;;  %v3289_v60 = vsel %vm988_vm1, %v6575_v35, -inf  ;;  %v1783_v62 = vsub.f32 -1e+30, %v6277_v3 }
 0x56f   : > { %3272 = vmax.xlane.f32.xlu1 %v3271_v28  ;;  %v1844_v28 = vsel %vm988_vm1, %v6326_v12, 0.0  ;;  %v1868_v12 = vsel %vm988_vm1, %v6374_v36, 0.0  ;;  %v1883_v36 = vsel %vm988_vm1, %v6393_v7, 0.0  ;;  %v1782_v7 = vsub.f32 -1e+30, %v6281_v8 }
 0x572   : > { %3293 = vmax.xlane.f32.xlu0 %v3292_v50  ;;  %v1780_v50 = vsub.f32 -1e+30, %v6273_v0 }
 0x573   : > { %3278 = vmax.xlane.f32.xlu1 %v3277_v53 }
 0x577   : > { %3284 = vmax.xlane.f32.xlu1 %v3283_v55  ;;  %v1793_v55 = vmul.f32 1.442695, %v1777_v34  ;;  %v1787_v34 = vsub.f32 -1e+30, %v6299_v23 }
 0x57b   : > { %3290 = vmax.xlane.f32.xlu1 %v3289_v60  ;;  %v1781_v60 = vsub.f32 -1e+30, %v6269_v56 }
 0x588   : > { %4013 = vrot.lane.b32.xlu0 %v6390_v57, %s5763_s26  ;;  %v1865_v57 = vsel %vm988_vm1, %v6361_v1, 0.0  ;;  %v1871_v1 = vsel %vm988_vm1, %v6379_v46, 0.0  ;;  %v1880_v46 = vsel %vm988_vm1, %v6404_v29, 0.0  ;;  %v1799_v29 = vmul.f32 1.442695, %v1780_v50 }
 0x58c   : > { %4098 = vrot.lane.b32.xlu1 %v6406_v21, %s5763_s26  ;;  %v1778_v21 = vsub.f32 -1e+30, %v6267_v38 }
 0x58e   : > { %v1795_v53 = vmul.f32 1.442695, %v1778_v21 }
 0x590   : > { %5421 = vpow2.f32 %v1795_v53 }
 0x591   : > { %5423 = vpow2.f32 %v1793_v55  ;;  %v1791_v55 = vsub.f32 -1e+30, %v6311_v27 }
 0x592   : > { %5425 = vpow2.f32 %v1799_v29  ;;  %v6633_v29 = vpop.permute.xlu0 %3843 }
 0x5a7   : > { %1842 = vadd.xlane.f32.xlu0 %v1841_v25  ;;  %v1784_v25 = vsub.f32 -1e+30, %v6289_v14 }
 0x5ab   : > { %1848 = vadd.xlane.f32.xlu0 %v1847_v32  ;;  %v1797_v32 = vmul.f32 1.442695, %v1779_v6  ;;  %v1792_v6 = vsub.f32 -1e+30, %v6335_v63 }
 0x5ad   : > { %5427 = vpow2.f32 %v1797_v32 }
 0x5af   : > { %1851 = vadd.xlane.f32.xlu0 %v1850_v31  ;;  %v1803_v31 = vmul.f32 1.442695, %v1782_v7 }
 0x5b0   : > { %1845 = vadd.xlane.f32.xlu1 %v1844_v28  ;;  %v1790_v28 = vsub.f32 -1e+30, %v6317_v11 }
 0x5b1   : > { %5429 = vpow2.f32 %v1803_v31  ;;  %v1813_v31 = vmul.f32 1.442695, %v1787_v34 }
 0x5b3   : > { %1866 = vadd.xlane.f32.xlu0 %v1865_v57  ;;  %v1801_v57 = vmul.f32 1.442695, %v1781_v60 }
 0x5b4   : > { %1854 = vadd.xlane.f32.xlu1 %v1853_v52  ;;  %v1786_v52 = vsub.f32 -1e+30, %v6295_v19 }
 0x5b5   : > { %5431 = vpow2.f32 %v1801_v57  ;;  %v1823_v57 = vmul.f32 1.442695, %v1792_v6 }
 0x5b7   : > { %1857 = vadd.xlane.f32.xlu0 %v1856_v59  ;;  %v1807_v59 = vmul.f32 1.442695, %v1784_v25 }
 0x5b8   : > { %1860 = vadd.xlane.f32.xlu1 %v1859_v20  ;;  %v1788_v20 = vsub.f32 -1e+30, %v6307_v30 }
 0x5b9   : > { %5433 = vpow2.f32 %v1807_v59 }
 0x5bb   : > { %1869 = vadd.xlane.f32.xlu0 %v1868_v12  ;;  %v1805_v12 = vmul.f32 1.442695, %v1783_v62  ;;  %v6635_v62 = vpop.permute.xlu1 %3928 }
 0x5bc   : > { %1872 = vadd.xlane.f32.xlu1 %v1871_v1  ;;  %v1819_v1 = vmul.f32 1.442695, %v1790_v28 }
 0x5bd   : > { %5435 = vpow2.f32 %v1805_v12 }
 0x5be   : > { %5437 = vpow2.f32 %v1819_v1 }
 0x5bf   : > { %1863 = vadd.xlane.f32.xlu0 %v1862_v16  ;;  %v1811_v16 = vmul.f32 1.442695, %v1786_v52 }
 0x5c0   : > { %1875 = vadd.xlane.f32.xlu1 %v1874_v5  ;;  %v1815_v5 = vmul.f32 1.442695, %v1788_v20  ;;  %v1821_v20 = vmul.f32 1.442695, %v1791_v55 }
 0x5c1   : > { %5439 = vpow2.f32 %v1811_v16 }
 0x5c2   : > { %5441 = vpow2.f32 %v1815_v5 }
 0x5c3   : > { %1878 = vadd.xlane.f32.xlu0 %v1877_v22  ;;  %v5422_v22 = vpop.eup %5421 }
 0x5c4   : > { %1884 = vadd.xlane.f32.xlu1 %v1883_v36  ;;  %v1789_v36 = vsub.f32 -1e+30, %v6293_v17  ;;  %v6637_v59 = vmul.f32 0.0, %v5422_v22 }
 0x5c6   : > { %v1817_v7 = vmul.f32 1.442695, %v1789_v36 }
 0x5c7   : > { %1881 = vadd.xlane.f32.xlu0 %v1880_v46  ;;  %v5424_v46 = vpop.eup %5423 }
 0x5c8   : > { %v5426_v21 = vpop.eup %5425  ;;  %5443 = vpow2.f32 %v1817_v7  ;;  %v6639_v1 = vmul.f32 0.0, %v5424_v46 }
 0x5c9   : > { %v5428_v50 = vpop.eup %5427  ;;  %v6641_v16 = vmul.f32 0.0, %v5426_v21 }
 0x5ca   : > { %v5430_v53 = vpop.eup %5429  ;;  %v6643_v5 = vmul.f32 0.0, %v5428_v50 }
 0x5cb   : > { %1887 = vadd.xlane.f32.xlu0 %v1886_v4  ;;  %v1785_v4 = vsub.f32 -1e+30, %v6287_v10  ;;  %v5432_v60 = vpop.eup %5431  ;;  %v6645_v35 = vmul.f32 0.0, %v5430_v53 }
 0x5cc   : > { %v5434_v32 = vpop.eup %5433  ;;  %v6647_v34 = vmul.f32 0.0, %v5432_v60 }
 0x5cd   : > { %v1809_v25 = vmul.f32 1.442695, %v1785_v4  ;;  %v5436_v28 = vpop.eup %5435  ;;  %v6650_v7 = vmul.f32 0.0, %v5434_v32 }
 0x5ce   : > { %v5438_v52 = vpop.eup %5437  ;;  %v6652_v55 = vmul.f32 0.0, %v5436_v28 }
 0x5cf   : > { %v5440_v12 = vpop.eup %5439  ;;  %5445 = vpow2.f32 %v1809_v25  ;;  %v6655_v21 = vmul.f32 0.0, %v5438_v52 }
 0x5d0   : > { %v5442_v4 = vpop.eup %5441  ;;  %5447 = vpow2.f32 %v1813_v31  ;;  %v6659_v60 = vmul.f32 0.0, %v5440_v12 }
 0x5d1   : > { %5449 = vpow2.f32 %v1823_v57  ;;  %v6661_v25 = vmul.f32 0.0, %v5442_v4  ;;  %v6667_v57 = vadd.f32 %v6477_v42, %v6637_v59 }
 0x5d2   : > { %5451 = vpow2.f32 %v1821_v20 }
 0x5e7   : > { %v3252_v36 = vpop.xlane.xlu0 %3251 }
 0x5e8   : > { %v3296_v22 = vmax.f32 %v6267_v38, %v3252_v36  ;;  %v3249_v6 = vpop.xlane.xlu1 %3248 }
 0x5e9   : > { %v3295_v46 = vmax.f32 %v6247_v48, %v3249_v6  ;;  %v6683_v6 = vadd.f32 %v6483_v45, %v6643_v5 }
 0x5ea   : > { %v3312_v50 = vsub.f32 %v6507_v2, %v3296_v22  ;;  %v3360_v53 = vsub.f32 %v6267_v38, %v3296_v22  ;;  %v6672_v38 = vadd.f32 %v6479_v43, %v6639_v1 }
 0x5eb   : > { %v3311_v31 = vsub.f32 %v6511_v26, %v3295_v46  ;;  %v3359_v32 = vsub.f32 %v6247_v48, %v3295_v46  ;;  %v3264_v28 = vpop.xlane.xlu0 %3263  ;;  %v6677_v48 = vadd.f32 %v6481_v44, %v6641_v16 }
 0x5ec   : > { %v3329_v52 = vmul.f32 1.442695, %v3312_v50  ;;  %v3377_v36 = vmul.f32 1.442695, %v3360_v53  ;;  %v3300_v20 = vmax.f32 %v6281_v8, %v3264_v28  ;;  %v3258_v2 = vpop.xlane.xlu1 %3257  ;;  %v6687_v53 = vpop.eup %5443 }
 0x5ed   : > { %v3327_v12 = vmul.f32 1.442695, %v3311_v31  ;;  %v3375_v4 = vmul.f32 1.442695, %v3359_v32  ;;  %v3298_v26 = vmax.f32 %v6273_v0, %v3258_v2  ;;  %v6690_v28 = vpop.eup %5445 }
 0x5ee   : > { %5453 = vpow2.f32 %v3329_v52  ;;  %v3316_v42 = vsub.f32 %v6519_v37, %v3300_v20  ;;  %v3364_v22 = vsub.f32 %v6281_v8, %v3300_v20 }
 0x5ef   : > { %5455 = vpow2.f32 %v3377_v36  ;;  %v3314_v43 = vsub.f32 %v6517_v33, %v3298_v26  ;;  %v3362_v46 = vsub.f32 %v6273_v0, %v3298_v26  ;;  %v3270_v50 = vpop.xlane.xlu0 %3269  ;;  %v6693_v36 = vpop.eup %5447  ;;  %v6697_v0 = vadd.f32 %v6485_v47, %v6645_v35 }
 0x5f0   : > { %5457 = vpow2.f32 %v3327_v12  ;;  %v3337_v44 = vmul.f32 1.442695, %v3316_v42  ;;  %v3385_v31 = vmul.f32 1.442695, %v3364_v22  ;;  %v3302_v32 = vmax.f32 %v6289_v14, %v3270_v50  ;;  %v3255_v37 = vpop.xlane.xlu1 %3254  ;;  %v6701_v2 = vpop.eup %5449 }
 0x5f1   : > { %5459 = vpow2.f32 %v3375_v4  ;;  %v3333_v8 = vmul.f32 1.442695, %v3314_v43  ;;  %v3381_v45 = vmul.f32 1.442695, %v3362_v46  ;;  %v3297_v52 = vmax.f32 %v6251_v15, %v3255_v37  ;;  %v6709_v22 = vpop.eup %5451 }
 0x5f2   : > { %5461 = vpow2.f32 %v3337_v44  ;;  %v3318_v33 = vsub.f32 %v6527_v9, %v3302_v32  ;;  %v3366_v20 = vsub.f32 %v6289_v14, %v3302_v32  ;;  %v6705_v12 = vadd.f32 %v6487_v49, %v6647_v34  ;;  %v7129_v44 = vld [vmem:[#allocation21_spill] sm:$0xff]  ;;  %v7130_v32 = vld [vmem:[#allocation22_spill] sm:$0xff] }
 0x5f3   : > { %5463 = vpow2.f32 %v3385_v31  ;;  %v3313_v4 = vsub.f32 %v6525_v18, %v3297_v52  ;;  %v3361_v26 = vsub.f32 %v6251_v15, %v3297_v52  ;;  %v3276_v42 = vpop.xlane.xlu0 %3275  ;;  %v6715_v31 = vadd.f32 %v7129_v44, %v6650_v7 }
 0x5f4   : > { %5465 = vpow2.f32 %v3333_v8  ;;  %v3341_v47 = vmul.f32 1.442695, %v3318_v33  ;;  %v3389_v43 = vmul.f32 1.442695, %v3366_v20  ;;  %v3304_v9 = vmax.f32 %v6295_v19, %v3276_v42  ;;  %v3261_v14 = vpop.xlane.xlu1 %3260 }
 0x5f5   : > { %5467 = vpow2.f32 %v3381_v45  ;;  %v3331_v46 = vmul.f32 1.442695, %v3313_v4  ;;  %v3379_v50 = vmul.f32 1.442695, %v3361_v26  ;;  %v3299_v49 = vmax.f32 %v6269_v56, %v3261_v14 }
 0x5f6   : > { %5469 = vpow2.f32 %v3341_v47  ;;  %v3320_v15 = vsub.f32 %v6530_v24, %v3304_v9  ;;  %v3368_v18 = vsub.f32 %v6295_v19, %v3304_v9  ;;  %v6721_v37 = vadd.f32 %v7130_v32, %v6659_v60 }
 0x5f7   : > { %5471 = vpow2.f32 %v3389_v43  ;;  %v3315_v8 = vsub.f32 %v6534_v41, %v3299_v49  ;;  %v3363_v45 = vsub.f32 %v6269_v56, %v3299_v49  ;;  %v3282_v52 = vpop.xlane.xlu0 %3281 }
 0x5f8   : > { %v5454_v33 = vpop.eup %5453  ;;  %5473 = vpow2.f32 %v3331_v46  ;;  %v3345_v20 = vmul.f32 1.442695, %v3320_v15  ;;  %v3393_v4 = vmul.f32 1.442695, %v3368_v18  ;;  %v3306_v26 = vmax.f32 %v6307_v30, %v3282_v52  ;;  %v3267_v42 = vpop.xlane.xlu1 %3266  ;;  %v7131_v52 = vld [vmem:[#allocation19_spill] sm:$0xff] }
 0x5f9   : > { %v6726_v24 = vpop.eup %5455  ;;  %5475 = vpow2.f32 %v3379_v50  ;;  %v3335_v19 = vmul.f32 1.442695, %v3315_v8  ;;  %v3383_v47 = vmul.f32 1.442695, %v3363_v45  ;;  %v3301_v9 = vmax.f32 %v6277_v3, %v3267_v42 }
 0x5fa   : > { %v5458_v43 = vpop.eup %5457  ;;  %5477 = vpow2.f32 %v3345_v20  ;;  %v3322_v41 = vsub.f32 %v6539_v39, %v3306_v26  ;;  %v3370_v56 = vsub.f32 %v6307_v30, %v3306_v26  ;;  %v3426_v14 = vsel %vm988_vm1, %v5454_v33, 0.0 }
 0x5fb   : > { %v6732_v46 = vpop.eup %5459  ;;  %5479 = vpow2.f32 %v3393_v4  ;;  %v3317_v49 = vsub.f32 %v6543_v61, %v3301_v9  ;;  %v3365_v44 = vsub.f32 %v6277_v3, %v3301_v9  ;;  %5239 = vmatprep.mubr.msk.f32.mxu0 %vm988_vm1, %v5458_v43  ;;  %3427 = vadd.xlane.f32.xlu0 %v3426_v14  ;;  %v3423_v50 = vsel %vm988_vm1, %v5458_v43, 0.0  ;;  %v3288_v15 = vpop.xlane.xlu0 %3287 }
 0x5fc   : > { %v6738_v18 = vpop.eup %5461  ;;  %5481 = vpow2.f32 %v3335_v19  ;;  %v3349_v39 = vmul.f32 1.442695, %v3322_v41  ;;  %v3397_v30 = vmul.f32 1.442695, %v3370_v56  ;;  %3424 = vadd.xlane.f32.xlu1 %v3423_v50  ;;  %5240 = vmatmul.mubr.msk.f32.vlgmr.msra.gmra.mrb[22].mxu0 %vm988_vm1, %v5454_v33  ;;  %v3308_v32 = vmax.f32 %v6317_v11, %v3288_v15  ;;  %v3273_v8 = vpop.xlane.xlu1 %3272 }
 0x5fd   : > { %v6742_v61 = vpop.eup %5463  ;;  %5483 = vpow2.f32 %v3383_v47  ;;  %v3339_v3 = vmul.f32 1.442695, %v3317_v49  ;;  %v3387_v45 = vmul.f32 1.442695, %v3365_v44  ;;  %5248 = vmatpush3.xpose.msk.msra.mxu0 %vm988_vm1, %v7131_v52  ;;  %v3303_v20 = vmax.f32 %v6287_v10, %v3273_v8 }
 0x5fe   : > { %v5466_v4 = vpop.eup %5465  ;;  %5485 = vpow2.f32 %v3349_v39  ;;  %v3324_v26 = vsub.f32 %v6548_v51, %v3308_v32  ;;  %v3372_v42 = vsub.f32 %v6317_v11, %v3308_v32  ;;  %5257 = vmatprep.subr.msk.mxu0 %vm988_vm1, %v6633_v29  ;;  %v3438_v33 = vsel %vm988_vm1, %v6738_v18, 0.0  ;;  %v7132_v39 = vld [vmem:[#allocation23_spill] sm:$0xff] }
 0x5ff   : > { %v6753_v19 = vpop.eup %5467  ;;  %5487 = vpow2.f32 %v3397_v30  ;;  %v3319_v47 = vsub.f32 %v6553_v40, %v3303_v20  ;;  %v3367_v9 = vsub.f32 %v6287_v10, %v3303_v20  ;;  %3439 = vadd.xlane.f32.xlu0 %v3438_v33  ;;  %v3432_v43 = vsel %vm988_vm1, %v5466_v4, 0.0  ;;  %v3294_v41 = vpop.xlane.xlu0 %3293 }
 0x600   : > { %v6758_v51 = vpop.eup %5469  ;;  %5489 = vpow2.f32 %v3339_v3  ;;  %v3353_v11 = vmul.f32 1.442695, %v3324_v26  ;;  %v3401_v56 = vmul.f32 1.442695, %v3372_v42  ;;  %3433 = vadd.xlane.f32.xlu1 %v3432_v43  ;;  %v3310_v14 = vmax.f32 %v6335_v63, %v3294_v41  ;;  %v3279_v49 = vpop.xlane.xlu1 %3278  ;;  %v7133_v42 = vld [vmem:[#allocation25_spill] sm:$0xff]  ;;  %v7134_v43 = vld [vmem:[#allocation20_spill] sm:$0xff] }
 0x601   : > { %v6761_v44 = vpop.eup %5471  ;;  %5491 = vpow2.f32 %v3387_v45  ;;  %v3343_v50 = vmul.f32 1.442695, %v3319_v47  ;;  %v3391_v40 = vmul.f32 1.442695, %v3367_v9  ;;  %v3305_v10 = vmax.f32 %v6299_v23, %v3279_v49 }
 0x602   : > { %v5474_v15 = vpop.eup %5473  ;;  %v6766_v30 = vadd.f32 %v7132_v39, %v6652_v55  ;;  %5493 = vpow2.f32 %v3353_v11  ;;  %v3326_v32 = vsub.f32 %v6558_v58, %v3310_v14  ;;  %v3374_v8 = vsub.f32 %v6335_v63, %v3310_v14 }
 0x603   : > { %v6770_v3 = vpop.eup %5475  ;;  %5495 = vpow2.f32 %v3401_v56  ;;  %v3321_v52 = vsub.f32 %v6563_v54, %v3305_v10  ;;  %v3369_v45 = vsub.f32 %v6299_v23, %v3305_v10  ;;  %5244 = vmatprep.mubr.msk.f32.mxu1 %vm988_vm1, %v5474_v15  ;;  %v3429_v20 = vsel %vm988_vm1, %v5474_v15, 0.0 }
 0x604   : > { %v6776_v26 = vpop.eup %5477  ;;  %v2588_v33 = vadd.f32 %v7133_v42, %v6661_v25  ;;  %5497 = vpow2.f32 %v3343_v50  ;;  %v3405_v58 = vmul.f32 1.442695, %v3374_v8  ;;  %3430 = vadd.xlane.f32.xlu1 %v3429_v20  ;;  %5245 = vmatmul.mubr.msk.f32.vlgmr.msra.gmra.mrb[30].mxu1 %vm988_vm1, %v5466_v4  ;;  %v3285_v63 = vpop.xlane.xlu1 %3284  ;;  %v6783_v54 = vmul.f32 %v6726_v24, %v6667_v57 }
 0x605   : > { %v6785_v23 = vpop.eup %5479  ;;  %5499 = vpow2.f32 %v3391_v40  ;;  %v3347_v47 = vmul.f32 1.442695, %v3321_v52  ;;  %v3395_v9 = vmul.f32 1.442695, %v3369_v45  ;;  %5253 = vmatpush3.xpose.msk.msra.mxu1 %vm988_vm1, %v7134_v43  ;;  %v3307_v41 = vmax.f32 %v6293_v17, %v3285_v63 }
 0x606   : > { %v5482_v11 = vpop.eup %5481  ;;  %v3357_v56 = vmul.f32 1.442695, %v3326_v32  ;;  %5262 = vmatprep.subr.msk.mxu1 %vm988_vm1, %v6635_v62  ;;  %v3444_v4 = vsel %vm988_vm1, %v6758_v51, 0.0  ;;  %v6796_v57 = vmul.f32 %v6732_v46, %v6672_v38  ;;  %v6800_v14 = vmul.f32 %v6753_v19, %v6677_v48  ;;  %v4014_v32 = vpop.permute.xlu0 %4013 }
 0x607   : > { %v6802_v49 = vpop.eup %5483  ;;  %5501 = vpow2.f32 %v3405_v58  ;;  %v3323_v50 = vsub.f32 %v6570_v13, %v3307_v41  ;;  %v3371_v40 = vsub.f32 %v6293_v17, %v3307_v41  ;;  %5249 = vmatprep.mubr.msk.f32.mxu0 %vm988_vm1, %v5482_v11  ;;  %v3435_v10 = vsel %vm988_vm1, %v5482_v11, 0.0 }
 0x608   : > { %v6808_v15 = vpop.eup %5485  ;;  %5503 = vpow2.f32 %v3347_v47  ;;  %5250 = vmatmul.mubr.msk.f32.vlgmr.msra.gmra.mrb[24].mxu0 %vm988_vm1, %v6738_v18  ;;  %3436 = vadd.xlane.f32.xlu0 %v3435_v10  ;;  %v3291_v38 = vpop.xlane.xlu1 %3290  ;;  %v6814_v48 = vmul.f32 %v6770_v3, %v6683_v6  ;;  %v6818_v13 = vmul.f32 %v6742_v61, %v6697_v0  ;;  %v6822_v17 = vmul.f32 %v6802_v49, %v6705_v12  ;;  %v7144_v10 = vld [vmem:[#allocation29_spill] sm:$0xff] }
 0x609   : > { %v6824_v39 = vpop.eup %5487  ;;  %5505 = vpow2.f32 %v3395_v9  ;;  %v3351_v8 = vmul.f32 1.442695, %v3323_v50  ;;  %v3399_v18 = vmul.f32 1.442695, %v3371_v40  ;;  %5258 = vmatpush3.xpose.msk.msra.mxu0 %vm988_vm1, %v6633_v29  ;;  %3445 = vadd.xlane.f32.xlu1 %v3444_v4  ;;  %v3309_v6 = vmax.f32 %v6311_v27, %v3291_v38  ;;  %v7139_v29 = vld [vmem:[#allocation31_spill] sm:$0xff] }
 0x60a   : > { %7135 = vst [vmem:[#allocation21_spill] sm:$0xff] %v6822_v17  ;;  %v5490_v52 = vpop.eup %5489  ;;  %5507 = vpow2.f32 %v3357_v56  ;;  %5267 = vmatprep.subr.msk.mxu0 %vm988_vm1, %v4014_v32  ;;  %v6832_v0 = vmul.f32 %v6761_v44, %v6715_v31  ;;  %v6836_v12 = vmul.f32 %v6785_v23, %v6721_v37  ;;  %v6839_v45 = vmul.f32 %v6824_v39, %v2588_v33  ;;  %v7140_v37 = vld [vmem:[#allocation27_spill] sm:$0xff]  ;;  %v7142_v56 = vld [vmem:[#allocation24_spill] sm:$0xff] }
 0x60b   : > { %v6841_v20 = vpop.eup %5491  ;;  %5509 = vpow2.f32 %v3351_v8  ;;  %v3325_v42 = vsub.f32 %v7139_v29, %v3309_v6  ;;  %v3373_v58 = vsub.f32 %v6311_v27, %v3309_v6  ;;  %5254 = vmatprep.mubr.msk.f32.mxu1 %vm988_vm1, %v5490_v52  ;;  %v3450_v31 = vsel %vm988_vm1, %v6776_v26, 0.0  ;;  %v7147_v6 = vld [vmem:[#allocation26_spill] sm:$0xff] }
 0x60c   : > { %7136 = vst [vmem:[#allocation22_spill] sm:$0xff] %v6832_v0  ;;  %7137 = vst [vmem:[#allocation19_spill] sm:$0xff] %v6836_v12  ;;  %v5494_v63 = vpop.eup %5493  ;;  %v6849_v47 = vmul.f32 0.0, %v6690_v28  ;;  %v2590_v33 = vadd.f32 %v7140_v37, %v6655_v21  ;;  %5511 = vpow2.f32 %v3399_v18  ;;  %5255 = vmatmul.mubr.msk.f32.vlgmr.msra.gmra.mrb[32].mxu1 %vm988_vm1, %v6758_v51  ;;  %3451 = vadd.xlane.f32.xlu0 %v3450_v31  ;;  %v4099_v9 = vpop.permute.xlu1 %4098  ;;  %v6866_v50 = vmul.f32 0.0, %v6701_v2 }
 0x60d   : > { %7138 = vst [vmem:[#allocation23_spill] sm:$0xff] %v6839_v45  ;;  %v6857_v27 = vmul.f32 %v6841_v20, %v6766_v30  ;;  %v6859_v43 = vpop.eup %5495  ;;  %v3355_v41 = vmul.f32 1.442695, %v3325_v42  ;;  %v3403_v11 = vmul.f32 1.442695, %v3373_v58  ;;  %5263 = vmatpush3.xpose.msk.msra.mxu1 %vm988_vm1, %v6635_v62  ;;  %v6875_v40 = vmul.f32 0.0, %v6693_v36 }
 0x60e   : > { %v5498_v28 = vpop.eup %5497  ;;  %v2585_v4 = vadd.f32 %v7142_v56, %v6849_v47  ;;  %5272 = vmatprep.subr.msk.mxu1 %vm988_vm1, %v4099_v9  ;;  %v6870_v51 = vmul.f32 %v6859_v43, %v2590_v33  ;;  %v2592_v38 = vadd.f32 %v7144_v10, %v6866_v50  ;;  %v3456_v2 = vsel %vm988_vm1, %v6808_v15, 0.0 }
 0x60f   : > { %7141 = vst [vmem:[#allocation25_spill] sm:$0xff] %v6857_v27  ;;  %v6872_v30 = vpop.eup %5499  ;;  %5513 = vpow2.f32 %v3355_v41  ;;  %5259 = vmatprep.mubr.msk.f32.mxu0 %vm988_vm1, %v5498_v28  ;;  %v3447_v62 = vsel %vm988_vm1, %v5498_v28, 0.0  ;;  %v2587_v29 = vadd.f32 %v7147_v6, %v6875_v40  ;;  %v3441_v31 = vsel %vm988_vm1, %v5490_v52, 0.0 }
 0x610   : > { %7143 = vst [vmem:[#allocation20_spill] sm:$0xff] %v6870_v51  ;;  %5515 = vpow2.f32 %v3403_v11  ;;  %3448 = vadd.xlane.f32.xlu1 %v3447_v62  ;;  %5260 = vmatmul.mubr.msk.f32.vlgmr.msra.gmra.mrb[26].mxu0 %vm988_vm1, %v6776_v26  ;;  %v6886_v8 = vmul.f32 %v6872_v30, %v2585_v4  ;;  %v6899_v26 = vmul.f32 0.0, %v6687_v53  ;;  %v7150_v11 = vld [vmem:[#allocation28_spill] sm:$0xff]  ;;  %v6916_v52 = vmul.f32 0.0, %v6709_v22 }
 0x611   : > { %v6888_v36 = vpop.eup %5501  ;;  %3457 = vadd.xlane.f32.xlu0 %v3456_v2  ;;  %5268 = vmatpush3.xpose.msk.msra.mxu0 %vm988_vm1, %v4014_v32  ;;  %v3462_v32 = vsel %vm988_vm1, %v5494_v63, 0.0 }
 0x612   : > { %7145 = vst [vmem:[#allocation31_spill] sm:$0xff] %v6886_v8  ;;  %7146 = vst [vmem:[#allocation27_spill] sm:$0xff] %v6888_v36  ;;  %v5504_v18 = vpop.eup %5503  ;;  %v6894_v42 = vmul.f32 %v6888_v36, %v2592_v38  ;;  %v2589_v28 = vadd.f32 %v7150_v11, %v6899_v26 }
 0x613   : > { %v6896_v58 = vpop.eup %5505  ;;  %5264 = vmatprep.mubr.msk.f32.mxu1 %vm988_vm1, %v5504_v18 }
 0x614   : > { %7148 = vst [vmem:[#allocation24_spill] sm:$0xff] %v6894_v42  ;;  %v5508_v37 = vpop.eup %5507  ;;  %3442 = vadd.xlane.f32.xlu1 %v3441_v31  ;;  %5265 = vmatmul.mubr.msk.f32.vlgmr.msra.gmra.mrb[34].mxu1 %vm988_vm1, %v6808_v15  ;;  %v6907_v33 = vmul.f32 %v6896_v58, %v2587_v29  ;;  %v3453_v15 = vsel %vm988_vm1, %v5504_v18, 0.0 }
 0x615   : > { %v5510_v41 = vpop.eup %5509  ;;  %5273 = vmatpush3.xpose.msk.msra.mxu1 %vm988_vm1, %v4099_v9  ;;  %3463 = vadd.xlane.f32.xlu0 %v3462_v32  ;;  %v3468_v4 = vsel %vm988_vm1, %v5508_v37, 0.0  ;;  %v7153_v9 = vld [vmem:[#allocation30_spill] sm:$0xff] }
 0x616   : > { %7149 = vst [vmem:[#allocation29_spill] sm:$0xff] %v6907_v33  ;;  %v6912_v53 = vpop.eup %5511  ;;  %5269 = vmatprep.mubr.msk.f32.mxu0 %vm988_vm1, %v5510_v41  ;;  %v2591_v10 = vadd.f32 %v7153_v9, %v6916_v52  ;;  %v3459_v22 = vsel %vm988_vm1, %v5510_v41, 0.0 }
 0x617   : > { %7151 = vst [vmem:[#allocation26_spill] sm:$0xff] %v6912_v53  ;;  %5270 = vmatmul.mubr.msk.f32.vlgmr.msra.gmra.mrb[28].mxu0 %vm988_vm1, %v5494_v63  ;;  %v6921_v56 = vmul.f32 %v6912_v53, %v2589_v28 }
 0x618   : > { %3454 = vadd.xlane.f32.xlu1 %v3453_v15 }
 0x619   : > { %7152 = vst [vmem:[#allocation28_spill] sm:$0xff] %v6921_v56  ;;  %v5514_v62 = vpop.eup %5513  ;;  %3469 = vadd.xlane.f32.xlu0 %v3468_v4 }
 0x61a   : > { %v6926_v38 = vpop.eup %5515  ;;  %5274 = vmatprep.mubr.msk.f32.mxu1 %vm988_vm1, %v5514_v62  ;;  %v3465_v2 = vsel %vm988_vm1, %v5514_v62, 0.0 }
 0x61b   : > { %7154 = vst [vmem:[#allocation30_spill] sm:$0xff] %v6926_v38  ;;  %5275 = vmatmul.mubr.msk.f32.vlgmr.msra.gmra.mrb[36].mxu1 %vm988_vm1, %v5508_v37  ;;  %v6932_v63 = vmul.f32 %v6926_v38, %v2591_v10 }
 0x61c   : > { %3460 = vadd.xlane.f32.xlu1 %v3459_v22 }
 0x61d   : > { %7155 = vst [vmem:[#allocation32_spill] sm:$0xff] %v6932_v63 }
 0x620   : > { %3466 = vadd.xlane.f32.xlu1 %v3465_v2 }
 0x634   : > { %v1843_v18 = vpop.xlane.xlu0 %1842 }
 0x635   : > { %v1889_v33 = vadd.f32 %v1843_v18, %v6639_v1 }
 0x637   : > { %v3407_v12 = vmul.f32 %v6732_v46, %v1889_v33 }
 0x638   : > { %v1849_v6 = vpop.xlane.xlu0 %1848 }
 0x639   : > { %v1891_v53 = vadd.f32 %v1849_v6, %v6643_v5 }
 0x63b   : > { %v3409_v46 = vmul.f32 %v6770_v3, %v1891_v53 }
 0x63c   : > { %v1852_v29 = vpop.xlane.xlu0 %1851 }
 0x63d   : > { %v1846_v31 = vpop.xlane.xlu1 %1845  ;;  %v1892_v17 = vadd.f32 %v1852_v29, %v6641_v16 }
 0x63e   : > { %v1890_v56 = vadd.f32 %v1846_v31, %v6637_v59 }
 0x63f   : > { %v3410_v1 = vmul.f32 %v6753_v19, %v1892_v17 }
 0x640   : > { %v1867_v32 = vpop.xlane.xlu0 %1866  ;;  %v3408_v8 = vmul.f32 %v6726_v24, %v1890_v56 }
 0x641   : > { %v1855_v11 = vpop.xlane.xlu1 %1854 }
 0x642   : > { %v1893_v24 = vadd.f32 %v1855_v11, %v6647_v34 }
 0x644   : > { %v1858_v28 = vpop.xlane.xlu0 %1857 }
 0x645   : > { %v1861_v15 = vpop.xlane.xlu1 %1860  ;;  %v1894_v31 = vadd.f32 %v1858_v28, %v6645_v35 }
 0x646   : > { %v1895_v5 = vadd.f32 %v1861_v15, %v6652_v55  ;;  %v1897_v55 = vadd.f32 %v1867_v32, %v6849_v47 }
 0x647   : > { %v3412_v16 = vmul.f32 %v6742_v61, %v1894_v31 }
 0x648   : > { %v1870_v4 = vpop.xlane.xlu0 %1869 }
 0x649   : > { %v1873_v9 = vpop.xlane.xlu1 %1872 }
 0x64c   : > { %v1864_v41 = vpop.xlane.xlu0 %1863 }
 0x64d   : > { %v1876_v42 = vpop.xlane.xlu1 %1875 }
 0x64e   : > { %v1900_v28 = vadd.f32 %v1876_v42, %v6661_v25 }
 0x650   : > { %v6935_v37 = vpop.xlane.xlu0 %1878 }
 0x651   : > { %v6937_v10 = vpop.xlane.xlu1 %1884  ;;  %v1901_v25 = vadd.f32 %v6935_v37, %v6899_v26 }
 0x652   : > { %7156 = vst [vmem:[#allocation33_spill] sm:$0xff] %v6937_v10 }
 0x654   : > { %v1882_v63 = vpop.xlane.xlu0 %1881 }
 0x655   : > { %v1902_v47 = vadd.f32 %v1882_v63, %v6655_v21 }
 0x658   : > { %v6939_v2 = vpop.xlane.xlu0 %1887 }
 0x659   : > { %v1904_v26 = vadd.f32 %v6939_v2, %v6866_v50  ;;  %v7157_v31 = vld [vmem:[#allocation33_spill] sm:$0xff] }
 0x688   : > { %v3428_v51 = vpop.xlane.xlu0 %3427 }
 0x689   : > { %v3425_v22 = vpop.xlane.xlu1 %3424  ;;  %v3472_v27 = vadd.f32 %v3428_v51, %v3408_v8 }
 0x68a   : > { %v3471_v0 = vadd.f32 %v3425_v22, %v3407_v12  ;;  %v1896_v12 = vadd.f32 %v1864_v41, %v6650_v7 }
 0x68b   : > { %5517 = vrcp.f32 %v3472_v27 }
 0x68c   : > { %v3440_v38 = vpop.xlane.xlu0 %3439  ;;  %5519 = vrcp.f32 %v3471_v0  ;;  %v3411_v0 = vmul.f32 %v6802_v49, %v1893_v24  ;;  %v3414_v7 = vmul.f32 %v6761_v44, %v1896_v12  ;;  %v3413_v49 = vmul.f32 %v6841_v20, %v1895_v5 }
 0x68d   : > { %v3434_v62 = vpop.xlane.xlu1 %3433  ;;  %v3476_v56 = vadd.f32 %v3440_v38, %v3412_v16  ;;  %v1899_v44 = vadd.f32 %v1873_v9, %v6875_v40 }
 0x68e   : > { %v3474_v51 = vadd.f32 %v3434_v62, %v3410_v1  ;;  %v7158_v1 = vld [vmem:[#allocation26_spill] sm:$0xff] }
 0x68f   : > { %v3417_v21 = vmul.f32 %v6896_v58, %v1899_v44  ;;  %v1903_v58 = vadd.f32 %v7157_v31, %v6916_v52  ;;  %v3419_v24 = vmul.f32 %v7158_v1, %v1901_v25  ;;  %v7171_v31 = vld [vmem:[#allocation32_spill] sm:$0xff] }
 0x690   : > { %5521 = vrcp.f32 %v3474_v51 }
 0x691   : > { %v3431_v45 = vpop.xlane.xlu1 %3430 }
 0x692   : > { %v3473_v8 = vadd.f32 %v3431_v45, %v3409_v46  ;;  %v1898_v45 = vadd.f32 %v1870_v4, %v6659_v60  ;;  %v7159_v46 = vld [vmem:[#allocation21_spill] sm:$0xff] }
 0x694   : > { %5523 = vrcp.f32 %v3473_v8  ;;  %v3416_v60 = vmul.f32 %v6785_v23, %v1898_v45  ;;  %v3418_v23 = vmul.f32 %v6824_v39, %v1900_v28 }
 0x695   : > { %v3437_v10 = vpop.xlane.xlu0 %3436  ;;  %v5518_v17 = vpop.eup %5517  ;;  %5525 = vrcp.f32 %v3476_v56 }
 0x696   : > { %v3446_v36 = vpop.xlane.xlu1 %3445  ;;  %v3475_v19 = vadd.f32 %v3437_v10, %v3411_v0  ;;  %v5520_v53 = vpop.eup %5519 }
 0x697   : > { %v3478_v18 = vadd.f32 %v3446_v36, %v3414_v7 }
 0x698   : > { %5527 = vrcp.f32 %v3475_v19  ;;  %v7162_v19 = vld [vmem:[#allocation30_spill] sm:$0xff] }
 0x699   : > { %v3452_v33 = vpop.xlane.xlu0 %3451  ;;  %5529 = vrcp.f32 %v3478_v18 }
 0x69a   : > { %v3480_v20 = vadd.f32 %v3452_v33, %v3416_v60  ;;  %v5522_v41 = vpop.eup %5521 }
 0x69d   : > { %v3449_v59 = vpop.xlane.xlu1 %3448 }
 0x69e   : > { %v3458_v6 = vpop.xlane.xlu0 %3457 }
 0x69f   : > { %v3482_v10 = vadd.f32 %v3458_v6, %v3418_v23 }
 0x6a1   : > { %v3443_v27 = vpop.xlane.xlu1 %3442 }
 0x6a2   : > { %v3464_v42 = vpop.xlane.xlu0 %3463 }
 0x6a5   : > { %v3455_v11 = vpop.xlane.xlu1 %3454 }
 0x6a6   : > { %v3481_v39 = vadd.f32 %v3455_v11, %v3417_v21  ;;  %v3470_v16 = vpop.xlane.xlu0 %3469 }
 0x6a9   : > { %v3461_v63 = vpop.xlane.xlu1 %3460 }
 0x6aa   : > { %v3483_v50 = vadd.f32 %v3461_v63, %v3419_v24 }
 0x6ad   : > { %v3467_v0 = vpop.xlane.xlu1 %3466 }
 0x6cf   : > { %v5241_v35 = vpop.f32.mrb[22].mxu0 }
 0x6d0   : > { %v4184_v34 = vadd.f32 %v5241_v35, %v6783_v54  ;;  %v3579_v3 = vpop.f32.mrb[23].mxu0  ;;  %v3477_v54 = vadd.f32 %v3443_v27, %v3413_v49  ;;  %v7161_v27 = vld [vmem:[#allocation22_spill] sm:$0xff] }
 0x6d1   : > { %v4183_v61 = vadd.f32 %v3579_v3, %v6796_v57  ;;  %v3415_v57 = vmul.f32 %v6872_v30, %v1897_v55  ;;  %v5524_v30 = vpop.eup %5523  ;;  %v7163_v3 = vld [vmem:[#allocation25_spill] sm:$0xff] }
 0x6d2   : > { %v4216_v38 = vmul.f32 %v5518_v17, %v4184_v34  ;;  %5531 = vrcp.f32 %v3477_v54  ;;  %v3421_v34 = vmul.f32 %v7162_v19, %v1903_v58  ;;  %v7165_v54 = vld [vmem:[#allocation31_spill] sm:$0xff] }
 0x6d3   : > { %v4215_v29 = vmul.f32 %v5520_v53, %v4183_v61  ;;  %v3479_v36 = vadd.f32 %v3449_v59, %v3415_v57  ;;  %5533 = vrcp.f32 %v3480_v20  ;;  %v5526_v59 = vpop.eup %5525 }
 0x6d4   : > { %v3485_v53 = vadd.f32 %v3467_v0, %v3421_v34 }
 0x6d5   : > { %4231 = vxpose.xlu1.b32.start [1/2] (short) (narrow) %v4215_v29, 8  ;;  %5535 = vrcp.f32 %v3479_v36 }
 0x6d6   : > { %5537 = vrcp.f32 %v3482_v10 }
 0x6d7   : > { %v5246_v32 = vpop.f32.mrb[30].mxu1  ;;  %5539 = vrcp.f32 %v3481_v39  ;;  %v7170_v39 = vld [vmem:[#allocation24_spill] sm:$0xff] }
 0x6d8   : > { %v4186_v15 = vadd.f32 %v5246_v32, %v6800_v14  ;;  %v3664_v4 = vpop.f32.mrb[31].mxu1  ;;  %v3420_v14 = vmul.f32 %v6859_v43, %v1902_v47  ;;  %v5528_v43 = vpop.eup %5527  ;;  %v7166_v47 = vld [vmem:[#allocation23_spill] sm:$0xff] }
 0x6d9   : > { %v4185_v40 = vadd.f32 %v3664_v4, %v6814_v48  ;;  %4232 = vxpose.xlu1.b32.end [2/2] (short) (narrow) %v4216_v38, 8  ;;  %v5530_v35 = vpop.eup %5529  ;;  %v7164_v38 = vld [vmem:[#allocation19_spill] sm:$0xff] }
 0x6da   : > { %v4218_v9 = vmul.f32 %v5522_v41, %v4186_v15  ;;  %v3484_v8 = vadd.f32 %v3464_v42, %v3420_v14  ;;  %v7167_v15 = vld [vmem:[#allocation29_spill] sm:$0xff] }
 0x6db   : > { %v4217_v22 = vmul.f32 %v5524_v30, %v4185_v40  ;;  %v5251_v62 = vpop.f32.mrb[24].mxu0  ;;  %v7168_v40 = vld [vmem:[#allocation20_spill] sm:$0xff] }
 0x6dc   : > { %v4188_v37 = vadd.f32 %v5251_v62, %v6818_v13  ;;  %v3749_v48 = vpop.f32.mrb[25].mxu0  ;;  %v7160_v13 = vld [vmem:[#allocation27_spill] sm:$0xff]  ;;  %v5532_v45 = vpop.eup %5531  ;;  %5541 = vrcp.f32 %v3484_v8 }
 0x6dd   : > { %v4187_v51 = vadd.f32 %v3749_v48, %v7159_v46  ;;  %4263 = vxpose.xlu0.b32.start [1/2] (short) (narrow) %v4217_v22, 8  ;;  %v3422_v5 = vmul.f32 %v7160_v13, %v1904_v26  ;;  %5543 = vrcp.f32 %v3483_v50  ;;  %v5534_v29 = vpop.eup %5533 }
 0x6de   : > { %v4220_v12 = vmul.f32 %v5526_v59, %v4188_v37 }
 0x6df   : > { %v4219_v2 = vmul.f32 %v5528_v43, %v4187_v51  ;;  %v5256_v33 = vpop.f32.mrb[32].mxu1  ;;  %v3486_v7 = vadd.f32 %v3470_v16, %v3422_v5  ;;  %v5536_v28 = vpop.eup %5535 }
 0x6e0   : > { %v4190_v56 = vadd.f32 %v5256_v33, %v7161_v27  ;;  %v3834_v52 = vpop.f32.mrb[33].mxu1  ;;  %v5538_v36 = vpop.eup %5537 }
 0x6e1   : > { %v4189_v17 = vadd.f32 %v3834_v52, %v7163_v3  ;;  %4264 = vxpose.xlu0.b32.end [2/2] (short) (narrow) %v4218_v9, 8  ;;  %5545 = vrcp.f32 %v3486_v7  ;;  %v5540_v41 = vpop.eup %5539  ;;  %v7169_v9 = vld [vmem:[#allocation28_spill] sm:$0xff] }
 0x6e2   : > { %v4222_v61 = vmul.f32 %v5530_v35, %v4190_v56  ;;  %5547 = vrcp.f32 %v3485_v53 }
 0x6e3   : > { %v4221_v55 = vmul.f32 %v5532_v45, %v4189_v17  ;;  %v5261_v49 = vpop.f32.mrb[26].mxu0 }
 0x6e4   : > { %v4192_v18 = vadd.f32 %v5261_v49, %v7164_v38  ;;  %v3919_v6 = vpop.f32.mrb[27].mxu0 }
 0x6e5   : > { %v4191_v11 = vadd.f32 %v3919_v6, %v7165_v54  ;;  %4295 = vxpose.xlu0.b32.start [1/2] (short) (narrow) %v4219_v2, 8 }
 0x6e6   : > { %v4224_v60 = vmul.f32 %v5534_v29, %v4192_v18  ;;  %v5542_v63 = vpop.eup %5541 }
 0x6e7   : > { %v4223_v44 = vmul.f32 %v5536_v28, %v4191_v11  ;;  %v5266_v57 = vpop.f32.mrb[34].mxu1  ;;  %v5544_v14 = vpop.eup %5543 }
 0x6e8   : > { %v4194_v20 = vadd.f32 %v5266_v57, %v7166_v47  ;;  %v4004_v32 = vpop.f32.mrb[35].mxu1 }
 0x6e9   : > { %v4193_v4 = vadd.f32 %v4004_v32, %v7167_v15  ;;  %4359 = vxpose.xlu1.b32.start [1/2] (short) (narrow) %v4223_v44, 8  ;;  %4296 = vxpose.xlu0.b32.end [2/2] (short) (narrow) %v4220_v12, 8  ;;  %v4627_v32 = vld [vmem:[#allocation8 + $0x8] sm:$0xff] }
 0x6ea   : > { %v4226_v25 = vmul.f32 %v5538_v36, %v4194_v20  ;;  %v5271_v23 = vpop.f32.mrb[28].mxu0  ;;  %v4626_v20 = vld [vmem:[#allocation8] sm:$0xff]  ;;  %v4628_v36 = vld [vmem:[#allocation8 + $0x10] sm:$0xff] }
 0x6eb   : > { %v4225_v42 = vmul.f32 %v5540_v41, %v4193_v4  ;;  %v4196_v30 = vadd.f32 %v5271_v23, %v7168_v40  ;;  %v4089_v21 = vpop.f32.mrb[29].mxu0  ;;  %v5546_v59 = vpop.eup %5545  ;;  %v5299_v15 = vpack.c.bf16 %v4627_v32, %v4626_v20  ;;  %v4629_v4 = vld [vmem:[#allocation8 + $0x18] sm:$0xff] }
 0x6ec   : > { %v4195_v10 = vadd.f32 %v4089_v21, %v7169_v9  ;;  %v5548_v1 = vpop.eup %5547  ;;  %v5303_v41 = vpack.c.bf16 %v4629_v4, %v4628_v36 }
 0x6ed   : > { %v4228_v22 = vmul.f32 %v5542_v63, %v4196_v30  ;;  %4327 = vxpose.xlu0.b32.start [1/2] (short) (narrow) %v4221_v55, 8  ;;  %4360 = vxpose.xlu1.b32.end [2/2] (short) (narrow) %v4224_v60, 8 }
 0x6ee   : > { %v4227_v62 = vmul.f32 %v5544_v14, %v4195_v10  ;;  %v5276_v26 = vpop.f32.mrb[36].mxu1  ;;  %5300 = vmatprep.subr.bf16.mxu0 %v5299_v15 }
 0x6ef   : > { %v4198_v37 = vadd.f32 %v5276_v26, %v7170_v39  ;;  %v4174_v48 = vpop.f32.mrb[37].mxu1  ;;  %5302 = vmatpush3.bf16.msra.mxu0 %v5299_v15 }
 0x6f0   : > { %v4197_v58 = vadd.f32 %v4174_v48, %v7171_v31  ;;  %5304 = vmatprep.subr.bf16.mxu0 %v5303_v41 }
 0x6f1   : > { %v4230_v24 = vmul.f32 %v5546_v59, %v4198_v37  ;;  %4328 = vxpose.xlu0.b32.end [2/2] (short) (narrow) %v4222_v61, 8  ;;  %4391 = vxpose.xlu1.b32.start [1/2] (short) (narrow) %v4225_v42, 8  ;;  %v4974_v37 = vld [vmem:[%s7074_s5] ss:$0 sm:$0xff] }
 0x6f2   : > { %v4229_v46 = vmul.f32 %v5548_v1, %v4197_v58 }
 0x6f3   : > { %5306 = vmatpush3.bf16.msra.mxu0 %v5303_v41 }
 0x6f5   : > { %4423 = vxpose.xlu0.b32.start [1/2] (short) (narrow) %v4227_v62, 8  ;;  %4392 = vxpose.xlu1.b32.end [2/2] (short) (narrow) %v4226_v25, 8 }
 0x6f9   : > { %4455 = vxpose.xlu1.b32.start [1/2] (short) (narrow) %v4229_v46, 8  ;;  %4424 = vxpose.xlu0.b32.end [2/2] (short) (narrow) %v4228_v22, 8  ;;  %v4973_v22 = vld [vmem:[%s7073_s4] ss:$0 sm:$0xff] }
 0x6fd   : > { %4456 = vxpose.xlu1.b32.end [2/2] (short) (narrow) %v4230_v24, 8 }
 0x755   : > { %v4247_v51 = vpop.trf.xlu1 }
 0x756   : > { %4487 = vxpose.xlu0.b32.start [1/4] (short) (narrow) %v4247_v51, 16 }
 0x75d   : > { %v4279_v43 = vpop.trf.xlu0 }
 0x75e   : > { %4488 = vxpose.xlu0.b32.cont [2/4] (short) (narrow) %v4279_v43, 16 }
 0x765   : > { %v4311_v8 = vpop.trf.xlu0 }
 0x766   : > { %4489 = vxpose.xlu0.b32.cont [3/4] (short) (narrow) %v4311_v8, 16 }
 0x769   : > { %v4375_v12 = vpop.trf.xlu1 }
 0x76a   : > { %4519 = vxpose.xlu1.b32.start [1/4] (short) (narrow) %v4375_v12, 16 }
 0x76d   : > { %v4343_v16 = vpop.trf.xlu0 }
 0x76e   : > { %4490 = vxpose.xlu0.b32.end [4/4] (short) (narrow) %v4343_v16, 16 }
 0x771   : > { %v4407_v50 = vpop.trf.xlu1 }
 0x772   : > { %4520 = vxpose.xlu1.b32.cont [2/4] (short) (narrow) %v4407_v50, 16 }
 0x775   : > { %v4439_v2 = vpop.trf.xlu0 }
 0x776   : > { %4521 = vxpose.xlu1.b32.cont [3/4] (short) (narrow) %v4439_v2, 16 }
 0x779   : > { %v4471_v33 = vpop.trf.xlu1 }
 0x77a   : > { %4522 = vxpose.xlu1.b32.end [4/4] (short) (narrow) %v4471_v33, 16 }
 0x7e2   : > { %v4503_v13 = vpop.trf.xlu0 }
 0x7e3   : > { %v4551_v5 = vsel %vm412_vm0, %v4503_v13, 0.0 }
 0x7e4   : > { %4552 = vadd.xlane.f32.xlu0 %v4551_v5 }
 0x7e6   : > { %v4504_v0 = vpop.trf.xlu0 }
 0x7e7   : > { %v4554_v27 = vsel %vm412_vm0, %v4504_v0, 0.0 }
 0x7e8   : > { %4555 = vadd.xlane.f32.xlu1 %v4554_v27 }
 0x7ee   : > { %v4535_v56 = vpop.trf.xlu1 }
 0x7ef   : > { %v4557_v52 = vsel %vm412_vm0, %v4535_v56, 0.0 }
 0x7f0   : > { %4558 = vadd.xlane.f32.xlu1 %v4557_v52 }
 0x7f2   : > { %v4536_v35 = vpop.trf.xlu1 }
 0x7f3   : > { %v4560_v19 = vsel %vm412_vm0, %v4536_v35, 0.0 }
 0x7f4   : > { %4561 = vadd.xlane.f32.xlu0 %v4560_v19 }
 0x871   : > { %v4553_v34 = vpop.xlane.xlu0 %4552 }
 0x872   : > { %v4564_v3 = vmul.f32 0.03125, %v4553_v34 }
 0x874   : > { %v4568_v17 = vsub.f32 %v4503_v13, %v4564_v3  ;;  %v4975_v13 = vld [vmem:[%s7076_s7] ss:$0 sm:$0xff] }
 0x875   : > { %v4556_v45 = vpop.xlane.xlu1 %4555 }
 0x876   : > { %v4565_v7 = vmul.f32 0.03125, %v4556_v45  ;;  %v4572_v61 = vmul.f32 %v4568_v17, %v4568_v17 }
 0x878   : > { %v4569_v53 = vsub.f32 %v4504_v0, %v4565_v7  ;;  %v4576_v55 = vsel %vm412_vm0, %v4572_v61, 0.0 }
 0x879   : > { %4577 = vadd.xlane.f32.xlu1 %v4576_v55 }
 0x87a   : > { %v4573_v49 = vmul.f32 %v4569_v53, %v4569_v53 }
 0x87c   : > { %v4579_v38 = vsel %vm412_vm0, %v4573_v49, 0.0 }
 0x87d   : > { %4580 = vadd.xlane.f32.xlu0 %v4579_v38  ;;  %v4559_v18 = vpop.xlane.xlu1 %4558 }
 0x87e   : > { %v4566_v6 = vmul.f32 0.03125, %v4559_v18 }
 0x880   : > { %v4570_v29 = vsub.f32 %v4535_v56, %v4566_v6 }
 0x881   : > { %v4562_v54 = vpop.xlane.xlu0 %4561 }
 0x882   : > { %v4567_v11 = vmul.f32 0.03125, %v4562_v54  ;;  %v4574_v28 = vmul.f32 %v4570_v29, %v4570_v29 }
 0x884   : > { %v4571_v60 = vsub.f32 %v4536_v35, %v4567_v11  ;;  %v4582_v44 = vsel %vm412_vm0, %v4574_v28, 0.0 }
 0x885   : > { %4583 = vadd.xlane.f32.xlu1 %v4582_v44 }
 0x886   : > { %v4575_v57 = vmul.f32 %v4571_v60, %v4571_v60 }
 0x888   : > { %v4585_v47 = vsel %vm412_vm0, %v4575_v57, 0.0 }
 0x889   : > { %4586 = vadd.xlane.f32.xlu0 %v4585_v47 }
 0x906   : > { %v4578_v25 = vpop.xlane.xlu1 %4577 }
 0x907   : > { %v4588_v23 = vmul.f32 0.03125, %v4578_v25 }
 0x909   : > { %v4592_v42 = vadd.f32 1e-05, %v4588_v23 }
 0x90a   : > { %v4581_v40 = vpop.xlane.xlu0 %4580 }
 0x90b   : > { %5549 = vrsqrt.f32 %v4592_v42  ;;  %v4589_v30 = vmul.f32 0.03125, %v4581_v40 }
 0x90d   : > { %v4593_v21 = vadd.f32 1e-05, %v4589_v30 }
 0x90f   : > { %5551 = vrsqrt.f32 %v4593_v21 }
 0x912   : > { %v4584_v63 = vpop.xlane.xlu1 %4583 }
 0x913   : > { %v4590_v9 = vmul.f32 0.03125, %v4584_v63 }
 0x915   : > { %v5550_v10 = vpop.eup %5549  ;;  %v4594_v14 = vadd.f32 1e-05, %v4590_v9 }
 0x916   : > { %v4587_v62 = vpop.xlane.xlu0 %4586  ;;  %v4600_v26 = vmul.f32 %v5550_v10, %v4568_v17 }
 0x917   : > { %5553 = vrsqrt.f32 %v4594_v14  ;;  %v4591_v39 = vmul.f32 0.03125, %v4587_v62 }
 0x918   : > { %v4611_v48 = vmul.f32 %v4973_v22, %v4600_v26 }
 0x919   : > { %v5552_v59 = vpop.eup %5551  ;;  %v4595_v31 = vadd.f32 1e-05, %v4591_v39 }
 0x91a   : > { %v4601_v58 = vmul.f32 %v5552_v59, %v4569_v53  ;;  %v4622_v1 = vadd.f32 %v4974_v37, %v4611_v48 }
 0x91b   : > { %5555 = vrsqrt.f32 %v4595_v31 }
 0x91c   : > { %5285 = vmatprep.mubr.msk.f32.mxu0 %vm412_vm0, %v4622_v1  ;;  %v4612_v24 = vmul.f32 %v4973_v22, %v4601_v58 }
 0x91e   : > { %v4623_v46 = vadd.f32 %v4974_v37, %v4612_v24 }
 0x920   : > { %5286 = vmatmul.mubr.msk.f32.vlgmr.msra.gmra.mrb[30].mxu0 %vm412_vm0, %v4623_v46 }
 0x921   : > { %v5554_v51 = vpop.eup %5553 }
 0x922   : > { %v4602_v43 = vmul.f32 %v5554_v51, %v4570_v29 }
 0x924   : > { %v4613_v8 = vmul.f32 %v4973_v22, %v4602_v43 }
 0x925   : > { %v5556_v12 = vpop.eup %5555 }
 0x926   : > { %v4624_v16 = vadd.f32 %v4974_v37, %v4613_v8  ;;  %v4603_v50 = vmul.f32 %v5556_v12, %v4571_v60 }
 0x928   : > { %5288 = vmatprep.mubr.msk.f32.mxu0 %vm412_vm0, %v4624_v16  ;;  %v4614_v2 = vmul.f32 %v4973_v22, %v4603_v50 }
 0x92a   : > { %v4625_v33 = vadd.f32 %v4974_v37, %v4614_v2 }
 0x92c   : > { %5289 = vmatmul.mubr.msk.f32.gmra.mrb[32].mxu0 %vm412_vm0, %v4625_v33 }
 0x9f3   : > { %v5287_v5 = vpop.f32.mrb[30].mxu0 }
 0x9f4   : > { %v4721_v0 = vadd.f32 %v5287_v5, %v4975_v13  ;;  %v4715_v27 = vpop.f32.mrb[31].mxu0 }
 0x9f5   : > { %v4716_v56 = vadd.f32 %v4975_v13, %v4715_v27 }
 0x9f6   : > { %4735 = vst.msk [vmem:[%s393_s2 + $0x8] sm:$0xff] %vm412_vm0, %v4721_v0 }
 0x9f7   : > { %4734 = vst.msk [vmem:[%s393_s2] sm:$0xff] %vm412_vm0, %v4716_v56 }
 0x9ff   : > { %v5290_v52 = vpop.f32.mrb[32].mxu0 }
 0xa00   : > { %v4731_v35 = vadd.f32 %v5290_v52, %v4975_v13  ;;  %v4725_v19 = vpop.f32.mrb[33].mxu0 }
 0xa01   : > { %v4726_v34 = vadd.f32 %v4975_v13, %v4725_v19 }
 0xa02   : > { %4737 = vst.msk [vmem:[%s393_s2 + $0x18] sm:$0xff] %vm412_vm0, %v4731_v35 }
 0xa03   : > { %4736 = vst.msk [vmem:[%s393_s2 + $0x10] sm:$0xff] %vm412_vm0, %v4726_v34 }
 0xa04   : > { %5686 = shalt.err (!%p5683_p7)
}
 0xa05   : > { %s5687_s20 = scalar_lea.hbm %s7023_s21, 512  ;;  %s5691_s23 = scalar_lea.hbm %s7077_s8, 1024 }
 0xa06   : > { %p5688_p9 = scmp.ne.s32.totalorder %s7023_s21, %s5687_s20  ;;  %p5692_p11 = scmp.lt.u32.totalorder %s7023_s21, %s7077_s8 }
 0xa07   : > { %p5693_p2 = scmp.lt.u32.totalorder %s5691_s23, %s5687_s20  ;;  %p5695_p1 = scmp.lt.u32.totalorder %s5687_s20, %s7023_s21 }
 0xa08   : > { %p5689_p0 = pnand %p5688_p9, %p7172_p13 }
 0xa09   : > { %p5694_p12 = por %p5693_p2, %p5692_p11 }
 0xa0a   : > { %p5690_p8 = pneg %p5689_p0 }
 0xa0b   : > { %p5696_p6 = por %p5695_p1, %p5694_p12 }
 0xa0d   : > { %p5697_p10 = pnand %p5696_p6, %p5690_p8 }
 0xa0f   : > { %5700 = shalt.err (!%p5697_p10)
}
 0xa10   : > { %s5765_s16 = smov 128   ;;  %s5766_s18 = smov 8  }
 0xa11   : > { %5319 = dma.vmem_to_hbm [thread:$0]  (%p7172_p13), %s7018_s17, 512, %s7023_s21, %s4739_s6, %s5765_s16, %s5765_s16, %s5766_s18  }
 0xa12 PF: > { %s4768_s2 = sand.u32 1, %s5739_s27   ;;  %p7173_p4 = scmp.ne.s32.totalorder %s7097_s12, 0 }
 0xa13   : > { %p7174_p5 = scmp.ge.s32.totalorder %s5751_s30, 2  ;;  %s4769_s0 = scalar_lea.sflag [#allocation4], %s4768_s2 }
 0xa15   : > { %p5336_p3 = pnand %p7174_p5, %p7173_p4 }
 0xa17   : > { %5734 = dma.done.wait (!%p5336_p3), %s4769_s0, 512  }
 0xa18   : > { %5736 = vsyncadd (!%p5336_p3), %s4769_s0, 4294966784  ;;  %s7175_s30 = sld [smem:[#allocation17_spill]]  ;;  %s7176_s29 = sld [smem:[#allocation16_spill]] }
 0xa19   : > { %s7177_s13 = sld [smem:[#allocation18_spill]]  ;;  %s7178_s27 = smov %s5743_s28 }
 0xa1e   : > { %p25_p7 = scmp.ge.s32.totalorder %s7175_s30, 4   ;;  %s7179_s28 = smov %s7176_s29 }
 0xa1f   : > { %s7180_s29 = smov %s7177_s13 }
 0xa20   :  { %27 = sbr.rel (!%p25_p7) target bundleno = 12 (0xc), region = 118 }
 0xa27   :  { %4774 = vsyncpa [#allocation3], 1 }
 0xa28   :  { %4776 = vsyncpa [#allocation3 + $0x1], 1 }
 0xa29   :  { %4777 = vsyncpa [#allocation6], 1 }
 0xa2a   :  { %4779 = vsyncpa [#allocation6 + $0x1], 1 }
 0xa2b   :  { %4780 = vsyncpa [#allocation9], 1 }
 0xa2c   :  { %4781 = vsyncpa [#allocation4], 1 }
 0xa2d   :  { %4783 = vsyncpa [#allocation4 + $0x1], 1 }

</bundles_post_ra>
